<compile_context>
chip_gen: v7x
topology: tpu7x:2x2x1
jax: 0.10.0
libtpu: 0.0.40
codegen_flags: <defaults>
</compile_context>

<pallas_src>
import numpy as np

import jax
import jax.numpy as jnp
from jax import lax
from jax.experimental import pallas as pl
from jax.experimental.pallas import tpu as pltpu

# Problem sizes hard-coded by the PyTorch module.
SEQ = 633          # timesteps (x.reshape((1, 633, 28)))
IN_FEAT = 28       # input features
H1 = 14            # lstm1 hidden size
H2 = 7             # lstm2 hidden size

# Kernel layout constants.
LSLOT = 32         # lanes per layer inside a gate group (H1=14, H2=7 <= 32)
GW = 2 * LSLOT     # gate group width: [layer1 | layer2] = 64 lanes
GATES_W = 4 * GW   # packed gate width (i|f|g|o) = 256 lanes
STATE_W = GW       # packed state width [h1|h2] / [c1|c2] = 64 lanes
XW = 32            # padded input feature width (28 -> 32)
UNROLL = 8         # time-loop unroll factor (one sublane tile per block)
T_LOOP = 640       # wavefront iterations (>= SEQ + 1, multiple of UNROLL)
T_X = 640          # padded x / xg rows (>= T_LOOP, multiple of 8)


# ----------------------------------------------------------------------------
# Fused two-layer LSTM encoder kernel (single pallas_call, wavefront schedule,
# packed [layer1|layer2] state and gates, one MXU dot per serial step).
# ----------------------------------------------------------------------------
def encoder_kernel(x_ref, wih1_ref, ball_ref, wstack_ref, out_ref, xg_scr):
    # Per-timestep input contributions for BOTH layers' gate lanes with one
    # big MXU matmul: layer-1 lanes get 0.5-scaled (W_ih1 x_t + b1); layer-2
    # lanes get only the (scaled) b2 bias - their "input" h1_t arrives through
    # the per-step recurrent matmul.
    xg_scr[...] = (
        jnp.dot(x_ref[...], wih1_ref[...], preferred_element_type=jnp.float32)
        + ball_ref[...]
    )

    # Loop-invariant fused recurrent weight hoisted into vregs once.
    w_stack = wstack_ref[...]                      # (64, 256)

    # Per-lane affine turning tanh(z/2) into sigmoid(z) on i/f/o gate groups
    # while leaving tanh(z) on the g-gate group (lanes [2*GW, 3*GW)).
    lane = lax.broadcasted_iota(jnp.int32, (1, GATES_W), 1)
    is_g = (lane >= 2 * GW) & (lane < 3 * GW)
    act_scale = jnp.where(is_g, 1.0, 0.5).astype(jnp.float32)
    act_shift = jnp.where(is_g, 0.0, 0.5).astype(jnp.float32)

    def cell(gates, cp):
        # gates: (1, 256) packed [i|f|g|o], each 64 lanes = [layer1 | layer2].
        a = jnp.tanh(gates) * act_scale + act_shift
        i = a[:, 0 * GW:1 * GW]
        f = a[:, 1 * GW:2 * GW]
        g = a[:, 2 * GW:3 * GW]
        o = a[:, 3 * GW:4 * GW]
        cn = f * cp + i * g                        # (1, 64) packed
        hn = o * jnp.tanh(cn)                      # (1, 64) packed
        return hn, cn                              # pad lanes stay exactly 0

    def one_step(xg_row, carry):
        # Wavefront iteration s: carry = ([h1_{s-1}|h2_{s-2}], [c1_{s-1}|c2_{s-2}]).
        # One fused MXU dot yields h1@W_hh1 on layer-1 lanes and
        # h1@W_ih2 + h2@W_hh2 on layer-2 lanes simultaneously.
        hp, cp = carry
        m = jnp.dot(hp, w_stack, preferred_element_type=jnp.float32)  # (1,256)
        return cell(xg_row + m, cp)   # -> ([h1_s | h2_{s-1}], [c1_s | c2_{s-1}])

    zeros = jnp.zeros((1, STATE_W), jnp.float32)

    # Peeled first block (s = 0..7).  At s = 0 both carries are zero, so the
    # layer-1 half computes h1_0 exactly; the layer-2 half would compute a
    # spurious "h2_{-1}", so its lanes are masked back to zero once (lstm2's
    # initial state must stay 0 for s = 1).
    l1_mask = (lax.broadcasted_iota(jnp.int32, (1, STATE_W), 1) < LSLOT
               ).astype(jnp.float32)
    xg_blk0 = xg_scr[0:UNROLL, :]                  # (8, 256) aligned load
    hn, cn = one_step(xg_blk0[0:1, :], (zeros, zeros))
    carry = (hn * l1_mask, cn * l1_mask)
    rows = [carry[0]]
    for j in range(1, UNROLL):                     # static unroll
        carry = one_step(xg_blk0[j:j + 1, :], carry)
        rows.append(carry[0])
    out_ref[0:UNROLL, :] = jnp.concatenate(rows, axis=0)   # one (8,64) store

    # Main wavefront loop: block b handles iterations s = 8b .. 8b+7.
    # Iteration s advances layer 1 to timestep s and layer 2 to timestep s-1,
    # writing the packed state (h2_{s-1} in lanes [32,39)) to out row s.
    def step_block(blk, carry):
        base = pl.multiple_of(blk * UNROLL, UNROLL)
        xg_blk = xg_scr[pl.ds(base, UNROLL), :]    # (8, 256) aligned load
        rows = []
        for j in range(UNROLL):                    # static 8x unroll
            carry = one_step(xg_blk[j:j + 1, :], carry)
            rows.append(carry[0])
        out_ref[pl.ds(base, UNROLL), :] = jnp.concatenate(rows, axis=0)
        return carry

    lax.fori_loop(1, T_LOOP // UNROLL, step_block, carry)


# ----------------------------------------------------------------------------
# Parameter packing (PyTorch LSTM layout -> packed / pre-scaled kernel layout).
# ----------------------------------------------------------------------------
def make_lstm_params(key, in_size, hidden):
    """PyTorch-default-style LSTM parameters (gate order i, f, g, o)."""
    k = 1.0 / np.sqrt(hidden)
    k1, k2, k3, k4 = jax.random.split(key, 4)
    w_ih = jax.random.uniform(k1, (4 * hidden, in_size), jnp.float32, -k, k)
    w_hh = jax.random.uniform(k2, (4 * hidden, hidden), jnp.float32, -k, k)
    b_ih = jax.random.uniform(k3, (4 * hidden,), jnp.float32, -k, k)
    b_hh = jax.random.uniform(k4, (4 * hidden,), jnp.float32, -k, k)
    return w_ih, w_hh, b_ih, b_hh


def pack_encoder_params(lstm1, lstm2):
    """Pack both LSTMs into the fused lane layout.

    Gate group g (i,f,g,o) occupies lanes [g*GW, (g+1)*GW); inside a group,
    layer-1 units sit in lanes [0, H1) and layer-2 units in [LSLOT, LSLOT+H2).
    i/f/o columns & biases are pre-scaled by 0.5 (tanh-as-sigmoid identity).
    """
    w_ih1, w_hh1, b_ih1, b_hh1 = map(np.asarray, lstm1)
    w_ih2, w_hh2, b_ih2, b_hh2 = map(np.asarray, lstm2)
    scales = (0.5, 0.5, 1.0, 0.5)                  # i, f, g, o

    wih1_p = np.zeros((XW, GATES_W), np.float32)       # (32, 256)
    w_stack = np.zeros((STATE_W, GATES_W), np.float32)  # (64, 256)
    b_all = np.zeros((1, GATES_W), np.float32)          # (1, 256)

    for g in range(4):
        s = scales[g]
        l1 = g * GW                               # layer-1 lanes of this gate
        wih1_p[:IN_FEAT, l1:l1 + H1] = s * w_ih1[g * H1:(g + 1) * H1, :].T
        w_stack[:H1, l1:l1 + H1] = s * w_hh1[g * H1:(g + 1) * H1, :].T
        b_all[0, l1:l1 + H1] = s * (b_ih1 + b_hh1)[g * H1:(g + 1) * H1]

        l2 = g * GW + LSLOT                       # layer-2 lanes of this gate
        w_stack[:H1, l2:l2 + H2] = s * w_ih2[g * H2:(g + 1) * H2, :].T
        w_stack[LSLOT:LSLOT + H2, l2:l2 + H2] = s * w_hh2[g * H2:(g + 1) * H2, :].T
        b_all[0, l2:l2 + H2] = s * (b_ih2 + b_hh2)[g * H2:(g + 1) * H2]

    return jnp.asarray(wih1_p), jnp.asarray(b_all), jnp.asarray(w_stack)


# ----------------------------------------------------------------------------
# Forward pass.
# ----------------------------------------------------------------------------
@jax.jit
def encoder_forward(x, params):
    wih1_p, b_all, w_stack = params
    x = jnp.reshape(x, (1, SEQ, IN_FEAT)).astype(jnp.float32)   # as the module
    x_pad = jnp.zeros((T_X, XW), jnp.float32).at[:SEQ, :IN_FEAT].set(x[0])

    out = pl.pallas_call(
        encoder_kernel,
        out_shape=jax.ShapeDtypeStruct((T_LOOP, STATE_W), jnp.float32),
        in_specs=[pl.BlockSpec(memory_space=pltpu.MemorySpace.VMEM)] * 4,
        out_specs=pl.BlockSpec(memory_space=pltpu.MemorySpace.VMEM),
        scratch_shapes=[pltpu.VMEM((T_X, GATES_W), jnp.float32)],  # xg precompute
    )(x_pad, wih1_p, b_all, w_stack)

    # Row s holds the packed state after wavefront iteration s, i.e. h2 at
    # timestep s-1 in lanes [LSLOT, LSLOT+H2).  Rows 0 and >= SEQ+1 are junk.
    return out[1:SEQ + 1, LSLOT:LSLOT + H2][None, :, :]     # (1, 633, 7)


# ----------------------------------------------------------------------------
# Pure-JAX reference (matches torch.nn.LSTM semantics) for self-checking.
# ----------------------------------------------------------------------------
def lstm_ref(x_seq, w_ih, w_hh, b_ih, b_hh):
    hidden = w_hh.shape[1]

    def step(carry, x_t):
        h, c = carry
        z = x_t @ w_ih.T + h @ w_hh.T + b_ih + b_hh
        i, f, g, o = jnp.split(z, 4)
        i = jax.nn.sigmoid(i)
        f = jax.nn.sigmoid(f)
        g = jnp.tanh(g)
        o = jax.nn.sigmoid(o)
        c = f * c + i * g
        h = o * jnp.tanh(c)
        return (h, c), h

    init = (jnp.zeros((hidden,), jnp.float32), jnp.zeros((hidden,), jnp.float32))
    _, hs = lax.scan(step, init, x_seq)
    return hs


if __name__ == "__main__":
    key = jax.random.PRNGKey(0)
    k_x, k1, k2 = jax.random.split(key, 3)

    # The module hard-codes reshape((1, 633, 28)), so x must hold 633*28 values.
    x = jax.random.normal(k_x, (SEQ, IN_FEAT), jnp.float32)
    lstm1 = make_lstm_params(k1, IN_FEAT, H1)   # LSTM(28 -> 14)
    lstm2 = make_lstm_params(k2, H1, H2)        # LSTM(14 -> 7)
    params = pack_encoder_params(lstm1, lstm2)

    encoded = encoder_forward(x, params)
    jax.block_until_ready(encoded)

    assert encoded.shape == (1, SEQ, H2)
    assert bool(jnp.all(jnp.isfinite(encoded)))

    # Correctness check against a plain-JAX LSTM stack (same math as PyTorch).
    h1_ref = lstm_ref(x, *lstm1)
    h2_ref = lstm_ref(h1_ref, *lstm2)
    err = float(jnp.max(jnp.abs(encoded[0] - h2_ref)))
    assert err < 1e-4, f"mismatch vs reference: max abs err = {err}"

    print("KERNEL_OK")
</pallas_src>

<mosaic_0001>
module attributes {stable_mosaic.version = 11 : i64} {
  func.func @encoder_kernel(%arg0: memref<640x32xf32, #tpu.memory_space<vmem>>, %arg1: memref<32x256xf32, #tpu.memory_space<vmem>>, %arg2: memref<1x256xf32, #tpu.memory_space<vmem>>, %arg3: memref<64x256xf32, #tpu.memory_space<vmem>>, %arg4: memref<640x64xf32, #tpu.memory_space<vmem>>, %arg5: memref<640x256xf32, #tpu.memory_space<vmem>>) attributes {dimension_semantics = [], scalar_prefetch = 0 : i64, scratch_operands = 1 : i64, tpu.core_type = #tpu.core_type<tc>} {
    %c0 = arith.constant 0 : index
    %c0_0 = arith.constant 0 : index
    %0 = vector.load %arg0[%c0, %c0_0] : memref<640x32xf32, #tpu.memory_space<vmem>>, vector<640x32xf32>
    %c0_1 = arith.constant 0 : index
    %c0_2 = arith.constant 0 : index
    %1 = vector.load %arg1[%c0_1, %c0_2] : memref<32x256xf32, #tpu.memory_space<vmem>>, vector<32x256xf32>
    %cst = arith.constant dense<0.000000e+00> : vector<640x256xf32>
    %2 = tpu.matmul %0, %1, %cst {dimension_numbers = #tpu.dot_dimension_numbers<[1], [0], [0], [1], [0, 0, 1, 1], [], []>} : vector<640x32xf32>, vector<32x256xf32>, vector<640x256xf32> -> vector<640x256xf32>
    %c0_3 = arith.constant 0 : index
    %c0_4 = arith.constant 0 : index
    %3 = vector.load %arg2[%c0_3, %c0_4] : memref<1x256xf32, #tpu.memory_space<vmem>>, vector<1x256xf32>
    %4 = vector.broadcast %3 : vector<1x256xf32> to vector<640x256xf32>
    %5 = arith.addf %2, %4 : vector<640x256xf32>
    %c0_5 = arith.constant 0 : index
    %c0_6 = arith.constant 0 : index
    %6 = vector.load %arg5[%c0_5, %c0_6] : memref<640x256xf32, #tpu.memory_space<vmem>>, vector<640x256xf32>
    tpu.vector_store %arg5[%c0_5, %c0_6], %5 {strides = array<i32>} : memref<640x256xf32, #tpu.memory_space<vmem>>, vector<640x256xf32>,
    %c0_7 = arith.constant 0 : index
    %c0_8 = arith.constant 0 : index
    %7 = vector.load %arg3[%c0_7, %c0_8] : memref<64x256xf32, #tpu.memory_space<vmem>>, vector<64x256xf32>
    %8 = tpu.iota {dimensions = array<i32: 1>} : vector<1x256xi32>
    %c128_i32 = arith.constant 128 : i32
    %9 = vector.broadcast %c128_i32 : i32 to vector<1x256xi32>
    %10 = arith.cmpi sge, %8, %9 : vector<1x256xi32>
    %c192_i32 = arith.constant 192 : i32
    %11 = vector.broadcast %c192_i32 : i32 to vector<1x256xi32>
    %12 = arith.cmpi slt, %8, %11 : vector<1x256xi32>
    %13 = arith.andi %10, %12 : vector<1x256xi1>
    %cst_9 = arith.constant 1.000000e+00 : f32
    %cst_10 = arith.constant 5.000000e-01 : f32
    %14 = vector.broadcast %cst_9 : f32 to vector<1x256xf32>
    %15 = vector.broadcast %cst_10 : f32 to vector<1x256xf32>
    %16 = arith.select %13, %14, %15 : vector<1x256xi1>, vector<1x256xf32>
    %cst_11 = arith.constant 0.000000e+00 : f32
    %cst_12 = arith.constant 5.000000e-01 : f32
    %17 = vector.broadcast %cst_11 : f32 to vector<1x256xf32>
    %18 = vector.broadcast %cst_12 : f32 to vector<1x256xf32>
    %19 = arith.select %13, %17, %18 : vector<1x256xi1>, vector<1x256xf32>
    %cst_13 = arith.constant 0.000000e+00 : f32
    %20 = vector.broadcast %cst_13 : f32 to vector<1x64xf32>
    %21 = tpu.iota {dimensions = array<i32: 1>} : vector<1x64xi32>
    %c32_i32 = arith.constant 32 : i32
    %22 = vector.broadcast %c32_i32 : i32 to vector<1x64xi32>
    %23 = arith.cmpi slt, %21, %22 : vector<1x64xi32>
    %24 = arith.extui %23 : vector<1x64xi1> to vector<1x64xi32>
    %25 = arith.sitofp %24 : vector<1x64xi32> to vector<1x64xf32>
    %c0_14 = arith.constant 0 : index
    %c0_15 = arith.constant 0 : index
    %26 = vector.load %arg5[%c0_14, %c0_15] : memref<640x256xf32, #tpu.memory_space<vmem>>, vector<8x256xf32>
    %27 = vector.extract_strided_slice %26 {offsets = [0, 0], sizes = [1, 256], strides = [1, 1]} : vector<8x256xf32> to vector<1x256xf32>
    %cst_16 = arith.constant dense<0.000000e+00> : vector<1x256xf32>
    %28 = tpu.matmul %20, %7, %cst_16 {dimension_numbers = #tpu.dot_dimension_numbers<[1], [0], [0], [1], [0, 0, 1, 1], [], []>} : vector<1x64xf32>, vector<64x256xf32>, vector<1x256xf32> -> vector<1x256xf32>
    %29 = arith.addf %27, %28 : vector<1x256xf32>
    %30 = math.tanh %29 : vector<1x256xf32>
    %31 = arith.mulf %30, %16 : vector<1x256xf32>
    %32 = arith.addf %31, %19 : vector<1x256xf32>
    %33 = vector.extract_strided_slice %32 {offsets = [0, 0], sizes = [1, 64], strides = [1, 1]} : vector<1x256xf32> to vector<1x64xf32>
    %34 = vector.extract_strided_slice %32 {offsets = [0, 64], sizes = [1, 64], strides = [1, 1]} : vector<1x256xf32> to vector<1x64xf32>
    %35 = vector.extract_strided_slice %32 {offsets = [0, 128], sizes = [1, 64], strides = [1, 1]} : vector<1x256xf32> to vector<1x64xf32>
    %36 = vector.extract_strided_slice %32 {offsets = [0, 192], sizes = [1, 64], strides = [1, 1]} : vector<1x256xf32> to vector<1x64xf32>
    %37 = arith.mulf %34, %20 : vector<1x64xf32>
    %38 = arith.mulf %33, %35 : vector<1x64xf32>
    %39 = arith.addf %37, %38 : vector<1x64xf32>
    %40 = math.tanh %39 : vector<1x64xf32>
    %41 = arith.mulf %36, %40 : vector<1x64xf32>
    %42 = arith.mulf %41, %25 : vector<1x64xf32>
    %43 = arith.mulf %39, %25 : vector<1x64xf32>
    %44 = vector.extract_strided_slice %26 {offsets = [1, 0], sizes = [1, 256], strides = [1, 1]} : vector<8x256xf32> to vector<1x256xf32>
    %cst_17 = arith.constant dense<0.000000e+00> : vector<1x256xf32>
    %45 = tpu.matmul %42, %7, %cst_17 {dimension_numbers = #tpu.dot_dimension_numbers<[1], [0], [0], [1], [0, 0, 1, 1], [], []>} : vector<1x64xf32>, vector<64x256xf32>, vector<1x256xf32> -> vector<1x256xf32>
    %46 = arith.addf %44, %45 : vector<1x256xf32>
    %47 = math.tanh %46 : vector<1x256xf32>
    %48 = arith.mulf %47, %16 : vector<1x256xf32>
    %49 = arith.addf %48, %19 : vector<1x256xf32>
    %50 = vector.extract_strided_slice %49 {offsets = [0, 0], sizes = [1, 64], strides = [1, 1]} : vector<1x256xf32> to vector<1x64xf32>
    %51 = vector.extract_strided_slice %49 {offsets = [0, 64], sizes = [1, 64], strides = [1, 1]} : vector<1x256xf32> to vector<1x64xf32>
    %52 = vector.extract_strided_slice %49 {offsets = [0, 128], sizes = [1, 64], strides = [1, 1]} : vector<1x256xf32> to vector<1x64xf32>
    %53 = vector.extract_strided_slice %49 {offsets = [0, 192], sizes = [1, 64], strides = [1, 1]} : vector<1x256xf32> to vector<1x64xf32>
    %54 = arith.mulf %51, %43 : vector<1x64xf32>
    %55 = arith.mulf %50, %52 : vector<1x64xf32>
    %56 = arith.addf %54, %55 : vector<1x64xf32>
    %57 = math.tanh %56 : vector<1x64xf32>
    %58 = arith.mulf %53, %57 : vector<1x64xf32>
    %59 = vector.extract_strided_slice %26 {offsets = [2, 0], sizes = [1, 256], strides = [1, 1]} : vector<8x256xf32> to vector<1x256xf32>
    %cst_18 = arith.constant dense<0.000000e+00> : vector<1x256xf32>
    %60 = tpu.matmul %58, %7, %cst_18 {dimension_numbers = #tpu.dot_dimension_numbers<[1], [0], [0], [1], [0, 0, 1, 1], [], []>} : vector<1x64xf32>, vector<64x256xf32>, vector<1x256xf32> -> vector<1x256xf32>
    %61 = arith.addf %59, %60 : vector<1x256xf32>
    %62 = math.tanh %61 : vector<1x256xf32>
    %63 = arith.mulf %62, %16 : vector<1x256xf32>
    %64 = arith.addf %63, %19 : vector<1x256xf32>
    %65 = vector.extract_strided_slice %64 {offsets = [0, 0], sizes = [1, 64], strides = [1, 1]} : vector<1x256xf32> to vector<1x64xf32>
    %66 = vector.extract_strided_slice %64 {offsets = [0, 64], sizes = [1, 64], strides = [1, 1]} : vector<1x256xf32> to vector<1x64xf32>
    %67 = vector.extract_strided_slice %64 {offsets = [0, 128], sizes = [1, 64], strides = [1, 1]} : vector<1x256xf32> to vector<1x64xf32>
    %68 = vector.extract_strided_slice %64 {offsets = [0, 192], sizes = [1, 64], strides = [1, 1]} : vector<1x256xf32> to vector<1x64xf32>
    %69 = arith.mulf %66, %56 : vector<1x64xf32>
    %70 = arith.mulf %65, %67 : vector<1x64xf32>
    %71 = arith.addf %69, %70 : vector<1x64xf32>
    %72 = math.tanh %71 : vector<1x64xf32>
    %73 = arith.mulf %68, %72 : vector<1x64xf32>
    %74 = vector.extract_strided_slice %26 {offsets = [3, 0], sizes = [1, 256], strides = [1, 1]} : vector<8x256xf32> to vector<1x256xf32>
    %cst_19 = arith.constant dense<0.000000e+00> : vector<1x256xf32>
    %75 = tpu.matmul %73, %7, %cst_19 {dimension_numbers = #tpu.dot_dimension_numbers<[1], [0], [0], [1], [0, 0, 1, 1], [], []>} : vector<1x64xf32>, vector<64x256xf32>, vector<1x256xf32> -> vector<1x256xf32>
    %76 = arith.addf %74, %75 : vector<1x256xf32>
    %77 = math.tanh %76 : vector<1x256xf32>
    %78 = arith.mulf %77, %16 : vector<1x256xf32>
    %79 = arith.addf %78, %19 : vector<1x256xf32>
    %80 = vector.extract_strided_slice %79 {offsets = [0, 0], sizes = [1, 64], strides = [1, 1]} : vector<1x256xf32> to vector<1x64xf32>
    %81 = vector.extract_strided_slice %79 {offsets = [0, 64], sizes = [1, 64], strides = [1, 1]} : vector<1x256xf32> to vector<1x64xf32>
    %82 = vector.extract_strided_slice %79 {offsets = [0, 128], sizes = [1, 64], strides = [1, 1]} : vector<1x256xf32> to vector<1x64xf32>
    %83 = vector.extract_strided_slice %79 {offsets = [0, 192], sizes = [1, 64], strides = [1, 1]} : vector<1x256xf32> to vector<1x64xf32>
    %84 = arith.mulf %81, %71 : vector<1x64xf32>
    %85 = arith.mulf %80, %82 : vector<1x64xf32>
    %86 = arith.addf %84, %85 : vector<1x64xf32>
    %87 = math.tanh %86 : vector<1x64xf32>
    %88 = arith.mulf %83, %87 : vector<1x64xf32>
    %89 = vector.extract_strided_slice %26 {offsets = [4, 0], sizes = [1, 256], strides = [1, 1]} : vector<8x256xf32> to vector<1x256xf32>
    %cst_20 = arith.constant dense<0.000000e+00> : vector<1x256xf32>
    %90 = tpu.matmul %88, %7, %cst_20 {dimension_numbers = #tpu.dot_dimension_numbers<[1], [0], [0], [1], [0, 0, 1, 1], [], []>} : vector<1x64xf32>, vector<64x256xf32>, vector<1x256xf32> -> vector<1x256xf32>
    %91 = arith.addf %89, %90 : vector<1x256xf32>
    %92 = math.tanh %91 : vector<1x256xf32>
    %93 = arith.mulf %92, %16 : vector<1x256xf32>
    %94 = arith.addf %93, %19 : vector<1x256xf32>
    %95 = vector.extract_strided_slice %94 {offsets = [0, 0], sizes = [1, 64], strides = [1, 1]} : vector<1x256xf32> to vector<1x64xf32>
    %96 = vector.extract_strided_slice %94 {offsets = [0, 64], sizes = [1, 64], strides = [1, 1]} : vector<1x256xf32> to vector<1x64xf32>
    %97 = vector.extract_strided_slice %94 {offsets = [0, 128], sizes = [1, 64], strides = [1, 1]} : vector<1x256xf32> to vector<1x64xf32>
    %98 = vector.extract_strided_slice %94 {offsets = [0, 192], sizes = [1, 64], strides = [1, 1]} : vector<1x256xf32> to vector<1x64xf32>
    %99 = arith.mulf %96, %86 : vector<1x64xf32>
    %100 = arith.mulf %95, %97 : vector<1x64xf32>
    %101 = arith.addf %99, %100 : vector<1x64xf32>
    %102 = math.tanh %101 : vector<1x64xf32>
    %103 = arith.mulf %98, %102 : vector<1x64xf32>
    %104 = vector.extract_strided_slice %26 {offsets = [5, 0], sizes = [1, 256], strides = [1, 1]} : vector<8x256xf32> to vector<1x256xf32>
    %cst_21 = arith.constant dense<0.000000e+00> : vector<1x256xf32>
    %105 = tpu.matmul %103, %7, %cst_21 {dimension_numbers = #tpu.dot_dimension_numbers<[1], [0], [0], [1], [0, 0, 1, 1], [], []>} : vector<1x64xf32>, vector<64x256xf32>, vector<1x256xf32> -> vector<1x256xf32>
    %106 = arith.addf %104, %105 : vector<1x256xf32>
    %107 = math.tanh %106 : vector<1x256xf32>
    %108 = arith.mulf %107, %16 : vector<1x256xf32>
    %109 = arith.addf %108, %19 : vector<1x256xf32>
    %110 = vector.extract_strided_slice %109 {offsets = [0, 0], sizes = [1, 64], strides = [1, 1]} : vector<1x256xf32> to vector<1x64xf32>
    %111 = vector.extract_strided_slice %109 {offsets = [0, 64], sizes = [1, 64], strides = [1, 1]} : vector<1x256xf32> to vector<1x64xf32>
    %112 = vector.extract_strided_slice %109 {offsets = [0, 128], sizes = [1, 64], strides = [1, 1]} : vector<1x256xf32> to vector<1x64xf32>
    %113 = vector.extract_strided_slice %109 {offsets = [0, 192], sizes = [1, 64], strides = [1, 1]} : vector<1x256xf32> to vector<1x64xf32>
    %114 = arith.mulf %111, %101 : vector<1x64xf32>
    %115 = arith.mulf %110, %112 : vector<1x64xf32>
    %116 = arith.addf %114, %115 : vector<1x64xf32>
    %117 = math.tanh %116 : vector<1x64xf32>
    %118 = arith.mulf %113, %117 : vector<1x64xf32>
    %119 = vector.extract_strided_slice %26 {offsets = [6, 0], sizes = [1, 256], strides = [1, 1]} : vector<8x256xf32> to vector<1x256xf32>
    %cst_22 = arith.constant dense<0.000000e+00> : vector<1x256xf32>
    %120 = tpu.matmul %118, %7, %cst_22 {dimension_numbers = #tpu.dot_dimension_numbers<[1], [0], [0], [1], [0, 0, 1, 1], [], []>} : vector<1x64xf32>, vector<64x256xf32>, vector<1x256xf32> -> vector<1x256xf32>
    %121 = arith.addf %119, %120 : vector<1x256xf32>
    %122 = math.tanh %121 : vector<1x256xf32>
    %123 = arith.mulf %122, %16 : vector<1x256xf32>
    %124 = arith.addf %123, %19 : vector<1x256xf32>
    %125 = vector.extract_strided_slice %124 {offsets = [0, 0], sizes = [1, 64], strides = [1, 1]} : vector<1x256xf32> to vector<1x64xf32>
    %126 = vector.extract_strided_slice %124 {offsets = [0, 64], sizes = [1, 64], strides = [1, 1]} : vector<1x256xf32> to vector<1x64xf32>
    %127 = vector.extract_strided_slice %124 {offsets = [0, 128], sizes = [1, 64], strides = [1, 1]} : vector<1x256xf32> to vector<1x64xf32>
    %128 = vector.extract_strided_slice %124 {offsets = [0, 192], sizes = [1, 64], strides = [1, 1]} : vector<1x256xf32> to vector<1x64xf32>
    %129 = arith.mulf %126, %116 : vector<1x64xf32>
    %130 = arith.mulf %125, %127 : vector<1x64xf32>
    %131 = arith.addf %129, %130 : vector<1x64xf32>
    %132 = math.tanh %131 : vector<1x64xf32>
    %133 = arith.mulf %128, %132 : vector<1x64xf32>
    %134 = vector.extract_strided_slice %26 {offsets = [7, 0], sizes = [1, 256], strides = [1, 1]} : vector<8x256xf32> to vector<1x256xf32>
    %cst_23 = arith.constant dense<0.000000e+00> : vector<1x256xf32>
    %135 = tpu.matmul %133, %7, %cst_23 {dimension_numbers = #tpu.dot_dimension_numbers<[1], [0], [0], [1], [0, 0, 1, 1], [], []>} : vector<1x64xf32>, vector<64x256xf32>, vector<1x256xf32> -> vector<1x256xf32>
    %136 = arith.addf %134, %135 : vector<1x256xf32>
    %137 = math.tanh %136 : vector<1x256xf32>
    %138 = arith.mulf %137, %16 : vector<1x256xf32>
    %139 = arith.addf %138, %19 : vector<1x256xf32>
    %140 = vector.extract_strided_slice %139 {offsets = [0, 0], sizes = [1, 64], strides = [1, 1]} : vector<1x256xf32> to vector<1x64xf32>
    %141 = vector.extract_strided_slice %139 {offsets = [0, 64], sizes = [1, 64], strides = [1, 1]} : vector<1x256xf32> to vector<1x64xf32>
    %142 = vector.extract_strided_slice %139 {offsets = [0, 128], sizes = [1, 64], strides = [1, 1]} : vector<1x256xf32> to vector<1x64xf32>
    %143 = vector.extract_strided_slice %139 {offsets = [0, 192], sizes = [1, 64], strides = [1, 1]} : vector<1x256xf32> to vector<1x64xf32>
    %144 = arith.mulf %141, %131 : vector<1x64xf32>
    %145 = arith.mulf %140, %142 : vector<1x64xf32>
    %146 = arith.addf %144, %145 : vector<1x64xf32>
    %147 = math.tanh %146 : vector<1x64xf32>
    %148 = arith.mulf %143, %147 : vector<1x64xf32>
    %149 = tpu.concatenate %42, %58, %73, %88, %103, %118, %133, %148 in 0 : vector<1x64xf32>, vector<1x64xf32>, vector<1x64xf32>, vector<1x64xf32>, vector<1x64xf32>, vector<1x64xf32>, vector<1x64xf32>, vector<1x64xf32> -> vector<8x64xf32>
    %c0_24 = arith.constant 0 : index
    %c0_25 = arith.constant 0 : index
    %150 = vector.load %arg4[%c0_24, %c0_25] : memref<640x64xf32, #tpu.memory_space<vmem>>, vector<8x64xf32>
    tpu.vector_store %arg4[%c0_24, %c0_25], %149 {strides = array<i32>} : memref<640x64xf32, #tpu.memory_space<vmem>>, vector<8x64xf32>,
    %c1_i32 = arith.constant 1 : i32
    %c79_i32 = arith.constant 79 : i32
    %151 = arith.addi %c1_i32, %c79_i32 : i32
    %c1_i32_26 = arith.constant 1 : i32
    %152:2 = scf.for %arg6 = %c1_i32 to %151 step %c1_i32_26 iter_args(%arg7 = %148, %arg8 = %146) -> (vector<1x64xf32>, vector<1x64xf32>)  : i32 {
      %c8_i32 = arith.constant 8 : i32
      %153 = arith.muli %arg6, %c8_i32 : i32
      %154 = tpu.assume_multiple %153, 8 : i32
      %155 = arith.index_cast %154 : i32 to index
      %c0_28 = arith.constant 0 : index
      %156 = vector.load %arg5[%155, %c0_28] : memref<640x256xf32, #tpu.memory_space<vmem>>, vector<8x256xf32>
      %157 = vector.extract_strided_slice %156 {offsets = [0, 0], sizes = [1, 256], strides = [1, 1]} : vector<8x256xf32> to vector<1x256xf32>
      %cst_29 = arith.constant dense<0.000000e+00> : vector<1x256xf32>
      %158 = tpu.matmul %arg7, %7, %cst_29 {dimension_numbers = #tpu.dot_dimension_numbers<[1], [0], [0], [1], [0, 0, 1, 1], [], []>} : vector<1x64xf32>, vector<64x256xf32>, vector<1x256xf32> -> vector<1x256xf32>
      %159 = arith.addf %157, %158 : vector<1x256xf32>
      %160 = math.tanh %159 : vector<1x256xf32>
      %161 = arith.mulf %160, %16 : vector<1x256xf32>
      %162 = arith.addf %161, %19 : vector<1x256xf32>
      %163 = vector.extract_strided_slice %162 {offsets = [0, 0], sizes = [1, 64], strides = [1, 1]} : vector<1x256xf32> to vector<1x64xf32>
      %164 = vector.extract_strided_slice %162 {offsets = [0, 64], sizes = [1, 64], strides = [1, 1]} : vector<1x256xf32> to vector<1x64xf32>
      %165 = vector.extract_strided_slice %162 {offsets = [0, 128], sizes = [1, 64], strides = [1, 1]} : vector<1x256xf32> to vector<1x64xf32>
      %166 = vector.extract_strided_slice %162 {offsets = [0, 192], sizes = [1, 64], strides = [1, 1]} : vector<1x256xf32> to vector<1x64xf32>
      %167 = arith.mulf %164, %arg8 : vector<1x64xf32>
      %168 = arith.mulf %163, %165 : vector<1x64xf32>
      %169 = arith.addf %167, %168 : vector<1x64xf32>
      %170 = math.tanh %169 : vector<1x64xf32>
      %171 = arith.mulf %166, %170 : vector<1x64xf32>
      %172 = vector.extract_strided_slice %156 {offsets = [1, 0], sizes = [1, 256], strides = [1, 1]} : vector<8x256xf32> to vector<1x256xf32>
      %cst_30 = arith.constant dense<0.000000e+00> : vector<1x256xf32>
      %173 = tpu.matmul %171, %7, %cst_30 {dimension_numbers = #tpu.dot_dimension_numbers<[1], [0], [0], [1], [0, 0, 1, 1], [], []>} : vector<1x64xf32>, vector<64x256xf32>, vector<1x256xf32> -> vector<1x256xf32>
      %174 = arith.addf %172, %173 : vector<1x256xf32>
      %175 = math.tanh %174 : vector<1x256xf32>
      %176 = arith.mulf %175, %16 : vector<1x256xf32>
      %177 = arith.addf %176, %19 : vector<1x256xf32>
      %178 = vector.extract_strided_slice %177 {offsets = [0, 0], sizes = [1, 64], strides = [1, 1]} : vector<1x256xf32> to vector<1x64xf32>
      %179 = vector.extract_strided_slice %177 {offsets = [0, 64], sizes = [1, 64], strides = [1, 1]} : vector<1x256xf32> to vector<1x64xf32>
      %180 = vector.extract_strided_slice %177 {offsets = [0, 128], sizes = [1, 64], strides = [1, 1]} : vector<1x256xf32> to vector<1x64xf32>
      %181 = vector.extract_strided_slice %177 {offsets = [0, 192], sizes = [1, 64], strides = [1, 1]} : vector<1x256xf32> to vector<1x64xf32>
      %182 = arith.mulf %179, %169 : vector<1x64xf32>
      %183 = arith.mulf %178, %180 : vector<1x64xf32>
      %184 = arith.addf %182, %183 : vector<1x64xf32>
      %185 = math.tanh %184 : vector<1x64xf32>
      %186 = arith.mulf %181, %185 : vector<1x64xf32>
      %187 = vector.extract_strided_slice %156 {offsets = [2, 0], sizes = [1, 256], strides = [1, 1]} : vector<8x256xf32> to vector<1x256xf32>
      %cst_31 = arith.constant dense<0.000000e+00> : vector<1x256xf32>
      %188 = tpu.matmul %186, %7, %cst_31 {dimension_numbers = #tpu.dot_dimension_numbers<[1], [0], [0], [1], [0, 0, 1, 1], [], []>} : vector<1x64xf32>, vector<64x256xf32>, vector<1x256xf32> -> vector<1x256xf32>
      %189 = arith.addf %187, %188 : vector<1x256xf32>
      %190 = math.tanh %189 : vector<1x256xf32>
      %191 = arith.mulf %190, %16 : vector<1x256xf32>
      %192 = arith.addf %191, %19 : vector<1x256xf32>
      %193 = vector.extract_strided_slice %192 {offsets = [0, 0], sizes = [1, 64], strides = [1, 1]} : vector<1x256xf32> to vector<1x64xf32>
      %194 = vector.extract_strided_slice %192 {offsets = [0, 64], sizes = [1, 64], strides = [1, 1]} : vector<1x256xf32> to vector<1x64xf32>
      %195 = vector.extract_strided_slice %192 {offsets = [0, 128], sizes = [1, 64], strides = [1, 1]} : vector<1x256xf32> to vector<1x64xf32>
      %196 = vector.extract_strided_slice %192 {offsets = [0, 192], sizes = [1, 64], strides = [1, 1]} : vector<1x256xf32> to vector<1x64xf32>
      %197 = arith.mulf %194, %184 : vector<1x64xf32>
      %198 = arith.mulf %193, %195 : vector<1x64xf32>
      %199 = arith.addf %197, %198 : vector<1x64xf32>
      %200 = math.tanh %199 : vector<1x64xf32>
      %201 = arith.mulf %196, %200 : vector<1x64xf32>
      %202 = vector.extract_strided_slice %156 {offsets = [3, 0], sizes = [1, 256], strides = [1, 1]} : vector<8x256xf32> to vector<1x256xf32>
      %cst_32 = arith.constant dense<0.000000e+00> : vector<1x256xf32>
      %203 = tpu.matmul %201, %7, %cst_32 {dimension_numbers = #tpu.dot_dimension_numbers<[1], [0], [0], [1], [0, 0, 1, 1], [], []>} : vector<1x64xf32>, vector<64x256xf32>, vector<1x256xf32> -> vector<1x256xf32>
      %204 = arith.addf %202, %203 : vector<1x256xf32>
      %205 = math.tanh %204 : vector<1x256xf32>
      %206 = arith.mulf %205, %16 : vector<1x256xf32>
      %207 = arith.addf %206, %19 : vector<1x256xf32>
      %208 = vector.extract_strided_slice %207 {offsets = [0, 0], sizes = [1, 64], strides = [1, 1]} : vector<1x256xf32> to vector<1x64xf32>
      %209 = vector.extract_strided_slice %207 {offsets = [0, 64], sizes = [1, 64], strides = [1, 1]} : vector<1x256xf32> to vector<1x64xf32>
      %210 = vector.extract_strided_slice %207 {offsets = [0, 128], sizes = [1, 64], strides = [1, 1]} : vector<1x256xf32> to vector<1x64xf32>
      %211 = vector.extract_strided_slice %207 {offsets = [0, 192], sizes = [1, 64], strides = [1, 1]} : vector<1x256xf32> to vector<1x64xf32>
      %212 = arith.mulf %209, %199 : vector<1x64xf32>
      %213 = arith.mulf %208, %210 : vector<1x64xf32>
      %214 = arith.addf %212, %213 : vector<1x64xf32>
      %215 = math.tanh %214 : vector<1x64xf32>
      %216 = arith.mulf %211, %215 : vector<1x64xf32>
      %217 = vector.extract_strided_slice %156 {offsets = [4, 0], sizes = [1, 256], strides = [1, 1]} : vector<8x256xf32> to vector<1x256xf32>
      %cst_33 = arith.constant dense<0.000000e+00> : vector<1x256xf32>
      %218 = tpu.matmul %216, %7, %cst_33 {dimension_numbers = #tpu.dot_dimension_numbers<[1], [0], [0], [1], [0, 0, 1, 1], [], []>} : vector<1x64xf32>, vector<64x256xf32>, vector<1x256xf32> -> vector<1x256xf32>
      %219 = arith.addf %217, %218 : vector<1x256xf32>
      %220 = math.tanh %219 : vector<1x256xf32>
      %221 = arith.mulf %220, %16 : vector<1x256xf32>
      %222 = arith.addf %221, %19 : vector<1x256xf32>
      %223 = vector.extract_strided_slice %222 {offsets = [0, 0], sizes = [1, 64], strides = [1, 1]} : vector<1x256xf32> to vector<1x64xf32>
      %224 = vector.extract_strided_slice %222 {offsets = [0, 64], sizes = [1, 64], strides = [1, 1]} : vector<1x256xf32> to vector<1x64xf32>
      %225 = vector.extract_strided_slice %222 {offsets = [0, 128], sizes = [1, 64], strides = [1, 1]} : vector<1x256xf32> to vector<1x64xf32>
      %226 = vector.extract_strided_slice %222 {offsets = [0, 192], sizes = [1, 64], strides = [1, 1]} : vector<1x256xf32> to vector<1x64xf32>
      %227 = arith.mulf %224, %214 : vector<1x64xf32>
      %228 = arith.mulf %223, %225 : vector<1x64xf32>
      %229 = arith.addf %227, %228 : vector<1x64xf32>
      %230 = math.tanh %229 : vector<1x64xf32>
      %231 = arith.mulf %226, %230 : vector<1x64xf32>
      %232 = vector.extract_strided_slice %156 {offsets = [5, 0], sizes = [1, 256], strides = [1, 1]} : vector<8x256xf32> to vector<1x256xf32>
      %cst_34 = arith.constant dense<0.000000e+00> : vector<1x256xf32>
      %233 = tpu.matmul %231, %7, %cst_34 {dimension_numbers = #tpu.dot_dimension_numbers<[1], [0], [0], [1], [0, 0, 1, 1], [], []>} : vector<1x64xf32>, vector<64x256xf32>, vector<1x256xf32> -> vector<1x256xf32>
      %234 = arith.addf %232, %233 : vector<1x256xf32>
      %235 = math.tanh %234 : vector<1x256xf32>
      %236 = arith.mulf %235, %16 : vector<1x256xf32>
      %237 = arith.addf %236, %19 : vector<1x256xf32>
      %238 = vector.extract_strided_slice %237 {offsets = [0, 0], sizes = [1, 64], strides = [1, 1]} : vector<1x256xf32> to vector<1x64xf32>
      %239 = vector.extract_strided_slice %237 {offsets = [0, 64], sizes = [1, 64], strides = [1, 1]} : vector<1x256xf32> to vector<1x64xf32>
      %240 = vector.extract_strided_slice %237 {offsets = [0, 128], sizes = [1, 64], strides = [1, 1]} : vector<1x256xf32> to vector<1x64xf32>
      %241 = vector.extract_strided_slice %237 {offsets = [0, 192], sizes = [1, 64], strides = [1, 1]} : vector<1x256xf32> to vector<1x64xf32>
      %242 = arith.mulf %239, %229 : vector<1x64xf32>
      %243 = arith.mulf %238, %240 : vector<1x64xf32>
      %244 = arith.addf %242, %243 : vector<1x64xf32>
      %245 = math.tanh %244 : vector<1x64xf32>
      %246 = arith.mulf %241, %245 : vector<1x64xf32>
      %247 = vector.extract_strided_slice %156 {offsets = [6, 0], sizes = [1, 256], strides = [1, 1]} : vector<8x256xf32> to vector<1x256xf32>
      %cst_35 = arith.constant dense<0.000000e+00> : vector<1x256xf32>
      %248 = tpu.matmul %246, %7, %cst_35 {dimension_numbers = #tpu.dot_dimension_numbers<[1], [0], [0], [1], [0, 0, 1, 1], [], []>} : vector<1x64xf32>, vector<64x256xf32>, vector<1x256xf32> -> vector<1x256xf32>
      %249 = arith.addf %247, %248 : vector<1x256xf32>
      %250 = math.tanh %249 : vector<1x256xf32>
      %251 = arith.mulf %250, %16 : vector<1x256xf32>
      %252 = arith.addf %251, %19 : vector<1x256xf32>
      %253 = vector.extract_strided_slice %252 {offsets = [0, 0], sizes = [1, 64], strides = [1, 1]} : vector<1x256xf32> to vector<1x64xf32>
      %254 = vector.extract_strided_slice %252 {offsets = [0, 64], sizes = [1, 64], strides = [1, 1]} : vector<1x256xf32> to vector<1x64xf32>
      %255 = vector.extract_strided_slice %252 {offsets = [0, 128], sizes = [1, 64], strides = [1, 1]} : vector<1x256xf32> to vector<1x64xf32>
      %256 = vector.extract_strided_slice %252 {offsets = [0, 192], sizes = [1, 64], strides = [1, 1]} : vector<1x256xf32> to vector<1x64xf32>
      %257 = arith.mulf %254, %244 : vector<1x64xf32>
      %258 = arith.mulf %253, %255 : vector<1x64xf32>
      %259 = arith.addf %257, %258 : vector<1x64xf32>
      %260 = math.tanh %259 : vector<1x64xf32>
      %261 = arith.mulf %256, %260 : vector<1x64xf32>
      %262 = vector.extract_strided_slice %156 {offsets = [7, 0], sizes = [1, 256], strides = [1, 1]} : vector<8x256xf32> to vector<1x256xf32>
      %cst_36 = arith.constant dense<0.000000e+00> : vector<1x256xf32>
      %263 = tpu.matmul %261, %7, %cst_36 {dimension_numbers = #tpu.dot_dimension_numbers<[1], [0], [0], [1], [0, 0, 1, 1], [], []>} : vector<1x64xf32>, vector<64x256xf32>, vector<1x256xf32> -> vector<1x256xf32>
      %264 = arith.addf %262, %263 : vector<1x256xf32>
      %265 = math.tanh %264 : vector<1x256xf32>
      %266 = arith.mulf %265, %16 : vector<1x256xf32>
      %267 = arith.addf %266, %19 : vector<1x256xf32>
      %268 = vector.extract_strided_slice %267 {offsets = [0, 0], sizes = [1, 64], strides = [1, 1]} : vector<1x256xf32> to vector<1x64xf32>
      %269 = vector.extract_strided_slice %267 {offsets = [0, 64], sizes = [1, 64], strides = [1, 1]} : vector<1x256xf32> to vector<1x64xf32>
      %270 = vector.extract_strided_slice %267 {offsets = [0, 128], sizes = [1, 64], strides = [1, 1]} : vector<1x256xf32> to vector<1x64xf32>
      %271 = vector.extract_strided_slice %267 {offsets = [0, 192], sizes = [1, 64], strides = [1, 1]} : vector<1x256xf32> to vector<1x64xf32>
      %272 = arith.mulf %269, %259 : vector<1x64xf32>
      %273 = arith.mulf %268, %270 : vector<1x64xf32>
      %274 = arith.addf %272, %273 : vector<1x64xf32>
      %275 = math.tanh %274 : vector<1x64xf32>
      %276 = arith.mulf %271, %275 : vector<1x64xf32>
      %277 = tpu.concatenate %171, %186, %201, %216, %231, %246, %261, %276 in 0 : vector<1x64xf32>, vector<1x64xf32>, vector<1x64xf32>, vector<1x64xf32>, vector<1x64xf32>, vector<1x64xf32>, vector<1x64xf32>, vector<1x64xf32> -> vector<8x64xf32>
      %278 = arith.index_cast %154 : i32 to index
      %c0_37 = arith.constant 0 : index
      %279 = vector.load %arg4[%278, %c0_37] : memref<640x64xf32, #tpu.memory_space<vmem>>, vector<8x64xf32>
      tpu.vector_store %arg4[%278, %c0_37], %277 {strides = array<i32>} : memref<640x64xf32, #tpu.memory_space<vmem>>, vector<8x64xf32>,
      scf.yield %276, %274 : vector<1x64xf32>, vector<1x64xf32>
    }
    %c79_i32_27 = arith.constant 79 : i32
    return
  }
}

</mosaic_0001>

<bundles_post_ra>
// kernel: encoder_forward.1
= control target key start
LH: loop header
LB: loop body
LE: loop exit
PB: predicated region body
PF: predicated region fallthrough
CT: control target
= control target key end

     0   :  { %v3318_v3 = vmov 0.0   ;;  %vm117_vm0 = vcmask 261120   ;;  %v107_v63 = vlaneseq  ;;  %vm1097_vm3 = vcmask 523264   ;;  %s4176_s5 = smov 1   ;;  %s4343_s1 = inlined_call_operand.vmem [shape: f32[32,256], index: 1, kind: input, shape index: {}]   ;;  %s4344_s3 = inlined_call_operand.vmem [shape: f32[64,256], index: 3, kind: input, shape index: {}]   ;;  %s4345_s0 = inlined_call_operand.vmem [shape: f32[640,32], index: 0, kind: input, shape index: {}]   ;;  %s4346_s2 = inlined_call_operand.vmem [shape: f32[1,256], index: 2, kind: input, shape index: {}]   ;;  %s4347_s4 = inlined_call_operand.vmem [shape: f32[640,64], index: 4, kind: output, shape index: {}]  }
   0x1   :  { %v98_v0 = vld [vmem:[%s4343_s1 + $0x8] sm:$0xff]  ;;  %v100_v1 = vld [vmem:[%s4343_s1 + $0x18] sm:$0xff]  ;;  %v97_v2 = vld [vmem:[%s4343_s1] sm:$0xff]  ;;  %752 = vmatprep.mubr.f32.mxu1 %v3318_v3  ;;  %422 = vmatprep.mubr.f32.mxu0 %v3318_v3  ;;  %vm1915_vm4 = vcmask 1040384   ;;  %vm1917_vm5 = vcmask 1041408   ;;  %vm1919_vm6 = vcmask 1042432  }
   0x2   :  { %v2899_v4 = vpack.c.bf16 %v100_v1, %v98_v0  ;;  %v99_v5 = vld [vmem:[%s4343_s1 + $0x10] sm:$0xff]  ;;  %v102_v6 = vld [vmem:[%s4343_s1 + $0x28] sm:$0xff]  ;;  %v104_v7 = vld [vmem:[%s4343_s1 + $0x38] sm:$0xff]  ;;  %v108_v0 = vshrl.u32 %v107_v63, 7  ;;  %vm1921_vm7 = vcmask 1043456   ;;  %vm1923_vm8 = vcmask 1044480  }
   0x3   :  { %v2901_v8 = vpack.c.bf16 %v99_v5, %v97_v2  ;;  %v2903_v9 = vpack.c.bf16 %v104_v7, %v102_v6  ;;  %v101_v10 = vld [vmem:[%s4343_s1 + $0x20] sm:$0xff]  ;;  %v103_v11 = vld [vmem:[%s4343_s1 + $0x30] sm:$0xff]  ;;  %v1064_v12 = vld [vmem:[%s4344_s3 + $0x8] sm:$0xff]  ;;  %vm1925_vm9 = vcmask 1045504   ;;  %vm1927_vm10 = vcmask 1046528  }
   0x4   :  { %3163 = vmatprep.subr.bf16.mxu1 %v2899_v4  ;;  %v1066_v13 = vld [vmem:[%s4344_s3 + $0x18] sm:$0xff]  ;;  %2900 = vmatprep.subr.bf16.mxu0 %v2899_v4  ;;  %v2905_v14 = vpack.c.bf16 %v103_v11, %v101_v10  ;;  %v1063_v16 = vld [vmem:[%s4344_s3] sm:$0xff]  ;;  %v1065_v17 = vld [vmem:[%s4344_s3 + $0x10] sm:$0xff]  ;;  %v109_v1 = vsub.s32 0, %v108_v0  ;;  %v113_v4 = vsub.s32 1, %v108_v0 }
   0x5   :  { %3165 = vmatpush1.bf16.msra.mxu1 %v2901_v8  ;;  %2902 = vmatpush1.bf16.msra.mxu0 %v2901_v8  ;;  %v3380_v15 = vpack.c.bf16 %v1066_v13, %v1064_v12  ;;  %v1068_v18 = vld [vmem:[%s4344_s3 + $0x28] sm:$0xff]  ;;  %v1070_v19 = vld [vmem:[%s4344_s3 + $0x38] sm:$0xff]  ;;  %v3397_v21 = vpack.c.bf16 %v1065_v17, %v1063_v16  ;;  %v1067_v23 = vld [vmem:[%s4344_s3 + $0x20] sm:$0xff] }
   0x6   :  { %3164 = vmatprep.subr.bf16.mxu1 %v2903_v9  ;;  %2904 = vmatprep.subr.bf16.mxu0 %v2903_v9  ;;  %v72_v20 = vld [vmem:[%s4345_s0 + $0x1b8] sm:$0xff]  ;;  %v3400_v22 = vpack.c.bf16 %v1070_v19, %v1068_v18  ;;  %v1069_v24 = vld [vmem:[%s4344_s3 + $0x30] sm:$0xff]  ;;  %v1072_v25 = vld [vmem:[%s4344_s3 + $0x48] sm:$0xff] }
   0x7   :  { %v1074_v26 = vld [vmem:[%s4344_s3 + $0x58] sm:$0xff]  ;;  %v73_v27 = vld [vmem:[%s4345_s0 + $0x1c0] sm:$0xff]  ;;  %v3420_v28 = vpack.c.bf16 %v1069_v24, %v1067_v23  ;;  %v1073_v31 = vld [vmem:[%s4344_s3 + $0x50] sm:$0xff] }
   0x8   :  { %v3423_v29 = vpack.c.bf16 %v1074_v26, %v1072_v25  ;;  %v1071_v30 = vld [vmem:[%s4344_s3 + $0x40] sm:$0xff]  ;;  %v1076_v32 = vld [vmem:[%s4344_s3 + $0x68] sm:$0xff]  ;;  %v1078_v33 = vld [vmem:[%s4344_s3 + $0x78] sm:$0xff] }
   0x9   :  { %3166 = vmatpush1.bf16.msra.mxu1 %v2905_v14  ;;  %2906 = vmatpush1.bf16.msra.mxu0 %v2905_v14  ;;  %v17_v34 = vld [vmem:[%s4345_s0] sm:$0xff]  ;;  %v74_v35 = vld [vmem:[%s4345_s0 + $0x1c8] sm:$0xff]  ;;  %v3446_v36 = vpack.c.bf16 %v1073_v31, %v1071_v30  ;;  %v3449_v37 = vpack.c.bf16 %v1078_v33, %v1076_v32  ;;  %v1077_v39 = vld [vmem:[%s4344_s3 + $0x70] sm:$0xff] }
   0xa   :  { %2908 = vmatprep.subr.bf16.mxu1 %v3380_v15  ;;  %v1075_v38 = vld [vmem:[%s4344_s3 + $0x60] sm:$0xff]  ;;  %v75_v40 = vld [vmem:[%s4345_s0 + $0x1d0] sm:$0xff]  ;;  %v76_v42 = vld [vmem:[%s4345_s0 + $0x1d8] sm:$0xff] }
   0xb   :  { %v3465_v41 = vpack.c.bf16 %v1077_v39, %v1075_v38  ;;  %v77_v43 = vld [vmem:[%s4345_s0 + $0x1e0] sm:$0xff]  ;;  %v78_v44 = vld [vmem:[%s4345_s0 + $0x1e8] sm:$0xff]  ;;  %v79_v45 = vld [vmem:[%s4345_s0 + $0x1f0] sm:$0xff] }
   0xc   :  { %2854 = vmatmul.mubr.msk.f32.vlgmr.msra.gmra.mrb[0].mxu1 %vm117_vm0, %v72_v20  ;;  %2799 = vmatmul.mubr.msk.f32.vlgmr.msra.gmra.mrb[0].mxu0 %vm117_vm0, %v17_v34  ;;  %v80_v46 = vld [vmem:[%s4345_s0 + $0x1f8] sm:$0xff]  ;;  %v81_v47 = vld [vmem:[%s4345_s0 + $0x200] sm:$0xff]  ;;  %v82_v48 = vld [vmem:[%s4345_s0 + $0x208] sm:$0xff] }
   0xd   :  { %2910 = vmatpush1.bf16.msra.mxu1 %v3397_v21  ;;  %758 = vmatprep.mubr.f32.mxu1 %v3318_v3  ;;  %v83_v49 = vld [vmem:[%s4345_s0 + $0x210] sm:$0xff]  ;;  %v84_v50 = vld [vmem:[%s4345_s0 + $0x218] sm:$0xff]  ;;  %v85_v51 = vld [vmem:[%s4345_s0 + $0x220] sm:$0xff] }
   0xe   :  { %2912 = vmatprep.subr.bf16.mxu1 %v3400_v22  ;;  %428 = vmatprep.mubr.f32.mxu0 %v3318_v3  ;;  %v86_v52 = vld [vmem:[%s4345_s0 + $0x228] sm:$0xff]  ;;  %v87_v53 = vld [vmem:[%s4345_s0 + $0x230] sm:$0xff]  ;;  %v88_v54 = vld [vmem:[%s4345_s0 + $0x238] sm:$0xff] }
   0xf   :  { %v89_v55 = vld [vmem:[%s4345_s0 + $0x240] sm:$0xff]  ;;  %v90_v56 = vld [vmem:[%s4345_s0 + $0x248] sm:$0xff]  ;;  %v91_v57 = vld [vmem:[%s4345_s0 + $0x250] sm:$0xff] }
  0x10   :  { %2855 = vmatmul.mubr.msk.f32.gmra.mrb[2].mxu1 %vm117_vm0, %v73_v27  ;;  %v92_v58 = vld [vmem:[%s4345_s0 + $0x258] sm:$0xff]  ;;  %v93_v59 = vld [vmem:[%s4345_s0 + $0x260] sm:$0xff]  ;;  %v94_v60 = vld [vmem:[%s4345_s0 + $0x268] sm:$0xff] }
  0x11   :  { %764 = vmatprep.mubr.f32.mxu1 %v3318_v3  ;;  %2914 = vmatpush1.bf16.msra.mxu1 %v3420_v28  ;;  %v95_v61 = vld [vmem:[%s4345_s0 + $0x270] sm:$0xff]  ;;  %v96_v62 = vld [vmem:[%s4345_s0 + $0x278] sm:$0xff]  ;;  %v105_v2 = vld [vmem:[%s4346_s2] sm:$0x3]  ;;  %s3320_s2 = smov 64  }
  0x12   :  { %2916 = vmatprep.subr.bf16.mxu1 %v3423_v29  ;;  %v3591_v5 = vrot.slane %v105_v2, %v109_v1  ;;  %v3593_v6 = vrot.slane %v105_v2, %v113_v4 }
  0x14   :  { %2856 = vmatmul.mubr.msk.f32.gmra.mrb[4].mxu1 %vm117_vm0, %v74_v35 }
  0x15   :  { %770 = vmatprep.mubr.f32.mxu1 %v3318_v3  ;;  %2918 = vmatpush1.bf16.msra.mxu1 %v3446_v36 }
  0x16   :  { %2920 = vmatprep.subr.bf16.mxu1 %v3449_v37 }
  0x18   :  { %2857 = vmatmul.mubr.msk.f32.gmra.mrb[6].mxu1 %vm117_vm0, %v75_v40 }
  0x19   :  { %776 = vmatprep.mubr.f32.mxu1 %v3318_v3  ;;  %2922 = vmatpush1.bf16.msra.mxu1 %v3465_v41 }
  0x1a   :  { %2924 = vmatprep.subr.bf16.mxu1 %v3380_v15 }
  0x1c   :  { %2858 = vmatmul.mubr.msk.f32.gmra.mrb[8].mxu1 %vm117_vm0, %v76_v42 }
  0x1d   :  { %782 = vmatprep.mubr.f32.mxu1 %v3318_v3 }
  0x20   :  { %2859 = vmatmul.mubr.msk.f32.gmra.mrb[10].mxu1 %vm117_vm0, %v77_v43 }
  0x21   :  { %788 = vmatprep.mubr.f32.mxu1 %v3318_v3 }
  0x24   :  { %2860 = vmatmul.mubr.msk.f32.gmra.mrb[12].mxu1 %vm117_vm0, %v78_v44 }
  0x25   :  { %794 = vmatprep.mubr.f32.mxu1 %v3318_v3 }
  0x28   :  { %2861 = vmatmul.mubr.msk.f32.gmra.mrb[14].mxu1 %vm117_vm0, %v79_v45 }
  0x29   :  { %800 = vmatprep.mubr.f32.mxu1 %v3318_v3 }
  0x2c   :  { %2862 = vmatmul.mubr.msk.f32.gmra.mrb[16].mxu1 %vm117_vm0, %v80_v46 }
  0x2d   :  { %806 = vmatprep.mubr.f32.mxu1 %v3318_v3 }
  0x30   :  { %2863 = vmatmul.mubr.msk.f32.gmra.mrb[18].mxu1 %vm117_vm0, %v81_v47 }
  0x31   :  { %812 = vmatprep.mubr.f32.mxu1 %v3318_v3 }
  0x34   :  { %2864 = vmatmul.mubr.msk.f32.gmra.mrb[20].mxu1 %vm117_vm0, %v82_v48 }
  0x35   :  { %818 = vmatprep.mubr.f32.mxu1 %v3318_v3 }
  0x38   :  { %2865 = vmatmul.mubr.msk.f32.gmra.mrb[22].mxu1 %vm117_vm0, %v83_v49 }
  0x39   :  { %824 = vmatprep.mubr.f32.mxu1 %v3318_v3 }
  0x3c   :  { %2866 = vmatmul.mubr.msk.f32.gmra.mrb[24].mxu1 %vm117_vm0, %v84_v50 }
  0x3d   :  { %830 = vmatprep.mubr.f32.mxu1 %v3318_v3 }
  0x40   :  { %2867 = vmatmul.mubr.msk.f32.gmra.mrb[26].mxu1 %vm117_vm0, %v85_v51 }
  0x41   :  { %836 = vmatprep.mubr.f32.mxu1 %v3318_v3 }
  0x44   :  { %2868 = vmatmul.mubr.msk.f32.gmra.mrb[28].mxu1 %vm117_vm0, %v86_v52 }
  0x45   :  { %842 = vmatprep.mubr.f32.mxu1 %v3318_v3 }
  0x48   :  { %2869 = vmatmul.mubr.msk.f32.gmra.mrb[30].mxu1 %vm117_vm0, %v87_v53 }
  0x49   :  { %848 = vmatprep.mubr.f32.mxu1 %v3318_v3 }
  0x4c   :  { %2870 = vmatmul.mubr.msk.f32.gmra.mrb[32].mxu1 %vm117_vm0, %v88_v54 }
  0x4d   :  { %854 = vmatprep.mubr.f32.mxu1 %v3318_v3 }
  0x50   :  { %2871 = vmatmul.mubr.msk.f32.gmra.mrb[34].mxu1 %vm117_vm0, %v89_v55 }
  0x51   :  { %860 = vmatprep.mubr.f32.mxu1 %v3318_v3 }
  0x54   :  { %2872 = vmatmul.mubr.msk.f32.gmra.mrb[36].mxu1 %vm117_vm0, %v90_v56 }
  0x55   :  { %866 = vmatprep.mubr.f32.mxu1 %v3318_v3 }
  0x58   :  { %2873 = vmatmul.mubr.msk.f32.gmra.mrb[38].mxu1 %vm117_vm0, %v91_v57 }
  0x59   :  { %872 = vmatprep.mubr.f32.mxu1 %v3318_v3 }
  0x5c   :  { %2874 = vmatmul.mubr.msk.f32.gmra.mrb[40].mxu1 %vm117_vm0, %v92_v58 }
  0x5d   :  { %878 = vmatprep.mubr.f32.mxu1 %v3318_v3 }
  0x60   :  { %2875 = vmatmul.mubr.msk.f32.gmra.mrb[42].mxu1 %vm117_vm0, %v93_v59 }
  0x61   :  { %884 = vmatprep.mubr.f32.mxu1 %v3318_v3 }
  0x64   :  { %2876 = vmatmul.mubr.msk.f32.gmra.mrb[44].mxu1 %vm117_vm0, %v94_v60 }
  0x65   :  { %890 = vmatprep.mubr.f32.mxu1 %v3318_v3 }
  0x68   :  { %2877 = vmatmul.mubr.msk.f32.gmra.mrb[46].mxu1 %vm117_vm0, %v95_v61 }
  0x69   :  { %896 = vmatprep.mubr.f32.mxu1 %v3318_v3 }
  0x6c   :  { %2878 = vmatmul.mubr.msk.f32.gmra.mrb[48].mxu1 %vm117_vm0, %v96_v62 }
  0x6d   :  { %1165 = vmatprep.mubr.f32.mxu1 %v3318_v3 }
  0x70   :  { %1166 = vmatmul.mubr.f32.vlgmr.msra.gmra.mrb[50].mxu1 %v3318_v3 }
  0x71   :  { %2926 = vmatpush1.bf16.msra.mxu1 %v3397_v21  ;;  %1264 = vmatprep.mubr.f32.mxu1 %v3318_v3 }
  0x72   :  { %2928 = vmatprep.subr.bf16.mxu1 %v3400_v22 }
  0x75   :  { %2930 = vmatpush1.bf16.msra.mxu1 %v3420_v28 }
  0x76   :  { %2932 = vmatprep.subr.bf16.mxu1 %v3423_v29 }
  0x79   :  { %2934 = vmatpush1.bf16.msra.mxu1 %v3446_v36 }
  0x7a   :  { %2936 = vmatprep.subr.bf16.mxu1 %v3449_v37 }
  0x7d   :  { %2938 = vmatpush1.bf16.msra.mxu1 %v3465_v41 }
  0x7e   :  { %2940 = vmatprep.subr.bf16.mxu1 %v3380_v15 }
  0xdf   :  { %v754_v7 = vpop.f32.mrb[0].mxu1  ;;  %v424_v16 = vpop.f32.mrb[0].mxu0 }
  0xe0   :  { %v755_v8 = vadd.f32 %v754_v7, %v3591_v5  ;;  %v756_v9 = vpop.f32.mrb[1].mxu1  ;;  %v3600_v17 = vadd.f32 %v424_v16, %v3591_v5  ;;  %v426_v18 = vpop.f32.mrb[1].mxu0 }
  0xe1   :  { %v757_v10 = vadd.f32 %v756_v9, %v3593_v6  ;;  %v3603_v20 = vadd.f32 %v426_v18, %v3593_v6 }
  0xe2   :  { %1013 = vst [vmem:[#allocation2 + $0x370] sm:$0xff] %v755_v8  ;;  %903 = vst [vmem:[#allocation2] sm:$0xff] %v3600_v17 }
  0xe3   :  { %1014 = vst [vmem:[#allocation2 + $0x378] sm:$0xff] %v757_v10  ;;  %v760_v11 = vpop.f32.mrb[2].mxu1  ;;  %904 = vst [vmem:[#allocation2 + $0x8] sm:$0xff] %v3603_v20 }
  0xe4   :  { %v761_v12 = vadd.f32 %v760_v11, %v3591_v5  ;;  %v762_v13 = vpop.f32.mrb[3].mxu1 }
  0xe5   :  { %v763_v14 = vadd.f32 %v762_v13, %v3593_v6 }
  0xe6   :  { %1015 = vst [vmem:[#allocation2 + $0x380] sm:$0xff] %v761_v12 }
  0xe7   :  { %1016 = vst [vmem:[#allocation2 + $0x388] sm:$0xff] %v763_v14  ;;  %v766_v19 = vpop.f32.mrb[4].mxu1 }
  0xe8   :  { %v767_v23 = vadd.f32 %v766_v19, %v3591_v5  ;;  %v768_v24 = vpop.f32.mrb[5].mxu1 }
  0xe9   :  { %v769_v25 = vadd.f32 %v768_v24, %v3593_v6 }
  0xea   :  { %1017 = vst [vmem:[#allocation2 + $0x390] sm:$0xff] %v767_v23 }
  0xeb   :  { %1018 = vst [vmem:[#allocation2 + $0x398] sm:$0xff] %v769_v25  ;;  %v772_v26 = vpop.f32.mrb[6].mxu1 }
  0xec   :  { %v773_v27 = vadd.f32 %v772_v26, %v3591_v5  ;;  %v774_v30 = vpop.f32.mrb[7].mxu1 }
  0xed   :  { %v775_v31 = vadd.f32 %v774_v30, %v3593_v6 }
  0xee   :  { %1019 = vst [vmem:[#allocation2 + $0x3a0] sm:$0xff] %v773_v27 }
  0xef   :  { %1020 = vst [vmem:[#allocation2 + $0x3a8] sm:$0xff] %v775_v31  ;;  %v778_v32 = vpop.f32.mrb[8].mxu1 }
  0xf0   :  { %v779_v33 = vadd.f32 %v778_v32, %v3591_v5  ;;  %v780_v34 = vpop.f32.mrb[9].mxu1 }
  0xf1   :  { %v781_v35 = vadd.f32 %v780_v34, %v3593_v6 }
  0xf2   :  { %1021 = vst [vmem:[#allocation2 + $0x3b0] sm:$0xff] %v779_v33 }
  0xf3   :  { %1022 = vst [vmem:[#allocation2 + $0x3b8] sm:$0xff] %v781_v35  ;;  %v784_v38 = vpop.f32.mrb[10].mxu1 }
  0xf4   :  { %v785_v39 = vadd.f32 %v784_v38, %v3591_v5  ;;  %v786_v40 = vpop.f32.mrb[11].mxu1 }
  0xf5   :  { %v787_v42 = vadd.f32 %v786_v40, %v3593_v6 }
  0xf6   :  { %1023 = vst [vmem:[#allocation2 + $0x3c0] sm:$0xff] %v785_v39 }
  0xf7   :  { %1024 = vst [vmem:[#allocation2 + $0x3c8] sm:$0xff] %v787_v42  ;;  %v790_v43 = vpop.f32.mrb[12].mxu1 }
  0xf8   :  { %v791_v44 = vadd.f32 %v790_v43, %v3591_v5  ;;  %v792_v45 = vpop.f32.mrb[13].mxu1 }
  0xf9   :  { %v793_v46 = vadd.f32 %v792_v45, %v3593_v6 }
  0xfa   :  { %1025 = vst [vmem:[#allocation2 + $0x3d0] sm:$0xff] %v791_v44 }
  0xfb   :  { %1026 = vst [vmem:[#allocation2 + $0x3d8] sm:$0xff] %v793_v46  ;;  %v796_v47 = vpop.f32.mrb[14].mxu1 }
  0xfc   :  { %v797_v48 = vadd.f32 %v796_v47, %v3591_v5  ;;  %v798_v49 = vpop.f32.mrb[15].mxu1 }
  0xfd   :  { %v799_v50 = vadd.f32 %v798_v49, %v3593_v6 }
  0xfe   :  { %1027 = vst [vmem:[#allocation2 + $0x3e0] sm:$0xff] %v797_v48 }
  0xff   :  { %1028 = vst [vmem:[#allocation2 + $0x3e8] sm:$0xff] %v799_v50  ;;  %v802_v51 = vpop.f32.mrb[16].mxu1 }
 0x100   :  { %v803_v52 = vadd.f32 %v802_v51, %v3591_v5  ;;  %v804_v53 = vpop.f32.mrb[17].mxu1 }
 0x101   :  { %v805_v54 = vadd.f32 %v804_v53, %v3593_v6 }
 0x102   :  { %1029 = vst [vmem:[#allocation2 + $0x3f0] sm:$0xff] %v803_v52 }
 0x103   :  { %1030 = vst [vmem:[#allocation2 + $0x3f8] sm:$0xff] %v805_v54  ;;  %v808_v55 = vpop.f32.mrb[18].mxu1 }
 0x104   :  { %v809_v56 = vadd.f32 %v808_v55, %v3591_v5  ;;  %v810_v57 = vpop.f32.mrb[19].mxu1 }
 0x105   :  { %v811_v58 = vadd.f32 %v810_v57, %v3593_v6 }
 0x106   :  { %1031 = vst [vmem:[#allocation2 + $0x400] sm:$0xff] %v809_v56 }
 0x107   :  { %1032 = vst [vmem:[#allocation2 + $0x408] sm:$0xff] %v811_v58  ;;  %v814_v59 = vpop.f32.mrb[20].mxu1 }
 0x108   :  { %v815_v60 = vadd.f32 %v814_v59, %v3591_v5  ;;  %v816_v61 = vpop.f32.mrb[21].mxu1 }
 0x109   :  { %v817_v62 = vadd.f32 %v816_v61, %v3593_v6 }
 0x10a   :  { %1033 = vst [vmem:[#allocation2 + $0x410] sm:$0xff] %v815_v60 }
 0x10b   :  { %1034 = vst [vmem:[#allocation2 + $0x418] sm:$0xff] %v817_v62  ;;  %v820_v0 = vpop.f32.mrb[22].mxu1 }
 0x10c   :  { %v821_v1 = vadd.f32 %v820_v0, %v3591_v5  ;;  %v822_v2 = vpop.f32.mrb[23].mxu1 }
 0x10d   :  { %v823_v4 = vadd.f32 %v822_v2, %v3593_v6 }
 0x10e   :  { %1035 = vst [vmem:[#allocation2 + $0x420] sm:$0xff] %v821_v1 }
 0x10f   :  { %1036 = vst [vmem:[#allocation2 + $0x428] sm:$0xff] %v823_v4  ;;  %v826_v7 = vpop.f32.mrb[24].mxu1 }
 0x110   :  { %v827_v8 = vadd.f32 %v826_v7, %v3591_v5  ;;  %v828_v9 = vpop.f32.mrb[25].mxu1 }
 0x111   :  { %v829_v10 = vadd.f32 %v828_v9, %v3593_v6 }
 0x112   :  { %1037 = vst [vmem:[#allocation2 + $0x430] sm:$0xff] %v827_v8 }
 0x113   :  { %1038 = vst [vmem:[#allocation2 + $0x438] sm:$0xff] %v829_v10  ;;  %v832_v11 = vpop.f32.mrb[26].mxu1 }
 0x114   :  { %v833_v12 = vadd.f32 %v832_v11, %v3591_v5  ;;  %v834_v13 = vpop.f32.mrb[27].mxu1 }
 0x115   :  { %v835_v14 = vadd.f32 %v834_v13, %v3593_v6 }
 0x116   :  { %1039 = vst [vmem:[#allocation2 + $0x440] sm:$0xff] %v833_v12  ;;  %v1080_v12 = vand.u32 127, %v107_v63 }
 0x117   :  { %1040 = vst [vmem:[#allocation2 + $0x448] sm:$0xff] %v835_v14  ;;  %v838_v16 = vpop.f32.mrb[28].mxu1 }
 0x118   :  { %v839_v18 = vadd.f32 %v838_v16, %v3591_v5  ;;  %v840_v19 = vpop.f32.mrb[29].mxu1  ;;  %v1081_v14 = vadd.s32 128, %v1080_v12  ;;  %v3319_v16 = vmov 0.5   ;;  %vm1092_vm2 = vcmp.lt.s32.totalorder %v1080_v12, 32 }
 0x119   :  { %v841_v23 = vadd.f32 %v840_v19, %v3593_v6 }
 0x11a   :  { %1041 = vst [vmem:[#allocation2 + $0x450] sm:$0xff] %v839_v18  ;;  %vm1085_vm1 = vcmp.lt.s32.totalorder %v1081_v14, 192 }
 0x11b   :  { %1042 = vst [vmem:[#allocation2 + $0x458] sm:$0xff] %v841_v23  ;;  %v844_v24 = vpop.f32.mrb[30].mxu1  ;;  %v3656_v18 = vsel %vm1085_vm1, 1.0, %v3319_v16 }
 0x11c   :  { %v845_v25 = vadd.f32 %v844_v24, %v3591_v5  ;;  %v846_v26 = vpop.f32.mrb[31].mxu1 }
 0x11d   :  { %v847_v27 = vadd.f32 %v846_v26, %v3593_v6 }
 0x11e   :  { %1043 = vst [vmem:[#allocation2 + $0x460] sm:$0xff] %v845_v25  ;;  %v3658_v25 = vsel %vm1085_vm1, 0.0, %v3319_v16 }
 0x11f   :  { %1044 = vst [vmem:[#allocation2 + $0x468] sm:$0xff] %v847_v27  ;;  %v850_v30 = vpop.f32.mrb[32].mxu1 }
 0x120   :  { %v851_v31 = vadd.f32 %v850_v30, %v3591_v5  ;;  %v852_v32 = vpop.f32.mrb[33].mxu1 }
 0x121   :  { %v853_v33 = vadd.f32 %v852_v32, %v3593_v6 }
 0x122   :  { %1045 = vst [vmem:[#allocation2 + $0x470] sm:$0xff] %v851_v31  ;;  %v2879_v31 = vsel %vm1092_vm2, 1.0, %v3318_v3 }
 0x123   :  { %1046 = vst [vmem:[#allocation2 + $0x478] sm:$0xff] %v853_v33  ;;  %v856_v34 = vpop.f32.mrb[34].mxu1 }
 0x124   :  { %v857_v35 = vadd.f32 %v856_v34, %v3591_v5  ;;  %v858_v38 = vpop.f32.mrb[35].mxu1 }
 0x125   :  { %v859_v39 = vadd.f32 %v858_v38, %v3593_v6 }
 0x126   :  { %1047 = vst [vmem:[#allocation2 + $0x480] sm:$0xff] %v857_v35 }
 0x127   :  { %1048 = vst [vmem:[#allocation2 + $0x488] sm:$0xff] %v859_v39  ;;  %v862_v40 = vpop.f32.mrb[36].mxu1 }
 0x128   :  { %v863_v42 = vadd.f32 %v862_v40, %v3591_v5  ;;  %v864_v43 = vpop.f32.mrb[37].mxu1 }
 0x129   :  { %v865_v44 = vadd.f32 %v864_v43, %v3593_v6 }
 0x12a   :  { %1049 = vst [vmem:[#allocation2 + $0x490] sm:$0xff] %v863_v42 }
 0x12b   :  { %1050 = vst [vmem:[#allocation2 + $0x498] sm:$0xff] %v865_v44  ;;  %v868_v45 = vpop.f32.mrb[38].mxu1 }
 0x12c   :  { %v869_v46 = vadd.f32 %v868_v45, %v3591_v5  ;;  %v870_v47 = vpop.f32.mrb[39].mxu1 }
 0x12d   :  { %v871_v48 = vadd.f32 %v870_v47, %v3593_v6 }
 0x12e   :  { %1051 = vst [vmem:[#allocation2 + $0x4a0] sm:$0xff] %v869_v46 }
 0x12f   :  { %1052 = vst [vmem:[#allocation2 + $0x4a8] sm:$0xff] %v871_v48  ;;  %v874_v49 = vpop.f32.mrb[40].mxu1 }
 0x130   :  { %v875_v50 = vadd.f32 %v874_v49, %v3591_v5  ;;  %v876_v51 = vpop.f32.mrb[41].mxu1 }
 0x131   :  { %v877_v52 = vadd.f32 %v876_v51, %v3593_v6 }
 0x132   :  { %1053 = vst [vmem:[#allocation2 + $0x4b0] sm:$0xff] %v875_v50 }
 0x133   :  { %1054 = vst [vmem:[#allocation2 + $0x4b8] sm:$0xff] %v877_v52  ;;  %v880_v53 = vpop.f32.mrb[42].mxu1 }
 0x134   :  { %v881_v54 = vadd.f32 %v880_v53, %v3591_v5  ;;  %v882_v55 = vpop.f32.mrb[43].mxu1 }
 0x135   :  { %v883_v56 = vadd.f32 %v882_v55, %v3593_v6 }
 0x136   :  { %1055 = vst [vmem:[#allocation2 + $0x4c0] sm:$0xff] %v881_v54 }
 0x137   :  { %1056 = vst [vmem:[#allocation2 + $0x4c8] sm:$0xff] %v883_v56  ;;  %v886_v57 = vpop.f32.mrb[44].mxu1 }
 0x138   :  { %v887_v58 = vadd.f32 %v886_v57, %v3591_v5  ;;  %v888_v59 = vpop.f32.mrb[45].mxu1 }
 0x139   :  { %v889_v60 = vadd.f32 %v888_v59, %v3593_v6 }
 0x13a   :  { %1057 = vst [vmem:[#allocation2 + $0x4d0] sm:$0xff] %v887_v58 }
 0x13b   :  { %1058 = vst [vmem:[#allocation2 + $0x4d8] sm:$0xff] %v889_v60  ;;  %v892_v61 = vpop.f32.mrb[46].mxu1 }
 0x13c   :  { %v893_v62 = vadd.f32 %v892_v61, %v3591_v5  ;;  %v894_v0 = vpop.f32.mrb[47].mxu1 }
 0x13d   :  { %v895_v1 = vadd.f32 %v894_v0, %v3593_v6 }
 0x13e   :  { %1059 = vst [vmem:[#allocation2 + $0x4e0] sm:$0xff] %v893_v62 }
 0x13f   :  { %1060 = vst [vmem:[#allocation2 + $0x4e8] sm:$0xff] %v895_v1  ;;  %v898_v2 = vpop.f32.mrb[48].mxu1 }
 0x140   :  { %v899_v4 = vadd.f32 %v898_v2, %v3591_v5  ;;  %v900_v7 = vpop.f32.mrb[49].mxu1 }
 0x141   :  { %v901_v8 = vadd.f32 %v900_v7, %v3593_v6 }
 0x142   :  { %1061 = vst [vmem:[#allocation2 + $0x4f0] sm:$0xff] %v899_v4 }
 0x143   :  { %1062 = vst [vmem:[#allocation2 + $0x4f8] sm:$0xff] %v901_v8  ;;  %v1167_v9 = vpop.f32.mrb[50].mxu1 }
 0x144   :  { %v1172_v10 = vadd.f32 %v1167_v9, %v3600_v17  ;;  %v1169_v11 = vpop.f32.mrb[51].mxu1 }
 0x145   :  { %v1173_v13 = vadd.f32 %v1169_v11, %v3603_v20 }
 0x146   :  { %3196 = vtanh.f32 %v1172_v10 }
 0x147   :  { %3198 = vtanh.f32 %v1173_v13 }
 0x150   :  { %v3197_v19 = vpop.eup %3196 }
 0x151   :  { %v3199_v23 = vpop.eup %3198  ;;  %v1176_v24 = vmul.f32 0.5, %v3197_v19 }
 0x152   :  { %v1177_v26 = vmul.f32 %v3199_v23, %v3656_v18 }
 0x153   :  { %v1178_v27 = vadd.f32 0.5, %v1176_v24 }
 0x154   :  { %v1179_v30 = vadd.f32 %v1177_v26, %v3658_v25 }
 0x155   :  { %v1180_v32 = vmul.f32 0.0, %v1178_v27 }
 0x156   :  { %v1181_v63 = vmul.f32 %v1179_v30, %v1178_v27 }
 0x158   :  { %1183 = vrot.lane.b32.xlu0 %v1181_v63, %s3320_s2 }
 0x15c   :  { %1190 = vrot.lane.b32.xlu0 %v2879_v31, %s3320_s2 }
 0x1ca   :  { %v1184_v33 = vpop.permute.xlu0 %1183 }
 0x1cb   :  { %v1186_v34 = vadd.f32 %v1184_v33, %v1180_v32 }
 0x1cd   :  { %3200 = vtanh.f32 %v1186_v34 }
 0x1ce   :  { %v1191_v39 = vpop.permute.xlu0 %1190 }
 0x1cf   :  { %v1194_v49 = vmul.f32 %v1191_v39, %v1186_v34 }
 0x1d1   :  { %v1286_v54 = vrot.slane %v1194_v49, 7 }
 0x1d7   :  { %v3201_v35 = vpop.eup %3200 }
 0x1d8   :  { %v1188_v38 = vmul.f32 %v3201_v35, %v1179_v30 }
 0x1da   :  { %v3665_v40 = vmul.f32 %v1191_v39, %v1188_v38 }
 0x1dc   :  { %1196 = vrot.lane.b32.xlu1 %v3665_v40, %s3320_s2 }
 0x24e   :  { %v1197_v42 = vpop.permute.xlu1 %1196 }
 0x24f   :  { %2880 = vmatmul.mubr.msk.f32.vlgmr.msra.gmra.mrb[52].mxu1 %vm1097_vm3, %v1197_v42 }
 0x250   :  { %2942 = vmatpush1.bf16.msra.mxu1 %v3397_v21  ;;  %1367 = vmatprep.mubr.f32.mxu1 %v3318_v3 }
 0x251   :  { %2944 = vmatprep.subr.bf16.mxu1 %v3400_v22 }
 0x254   :  { %2946 = vmatpush1.bf16.msra.mxu1 %v3420_v28 }
 0x255   :  { %2948 = vmatprep.subr.bf16.mxu1 %v3423_v29 }
 0x258   :  { %2950 = vmatpush1.bf16.msra.mxu1 %v3446_v36 }
 0x259   :  { %2952 = vmatprep.subr.bf16.mxu1 %v3449_v37 }
 0x25c   :  { %2954 = vmatpush1.bf16.msra.mxu1 %v3465_v41 }
 0x25d   :  { %2956 = vmatprep.subr.bf16.mxu1 %v3380_v15 }
 0x322   :  { %v1266_v43 = vpop.f32.mrb[52].mxu1 }
 0x323   :  { %v1273_v44 = vrot.slane %v1266_v43, 7  ;;  %v1268_v45 = vpop.f32.mrb[53].mxu1 }
 0x324   :  { %v1274_v46 = vrot.slane %v1268_v45, 7 }
 0x325   :  { %v1277_v47 = vadd.f32 %v1273_v44, %v3600_v17 }
 0x326   :  { %v1278_v48 = vadd.f32 %v1274_v46, %v3603_v20 }
 0x327   :  { %3202 = vtanh.f32 %v1277_v47 }
 0x328   :  { %3204 = vtanh.f32 %v1278_v48 }
 0x331   :  { %v3203_v50 = vpop.eup %3202 }
 0x332   :  { %v3205_v51 = vpop.eup %3204  ;;  %v1281_v52 = vmul.f32 0.5, %v3203_v50 }
 0x333   :  { %v1282_v53 = vmul.f32 %v3205_v51, %v3656_v18 }
 0x334   :  { %v1283_v55 = vadd.f32 0.5, %v1281_v52 }
 0x335   :  { %v1284_v56 = vadd.f32 %v1282_v53, %v3658_v25 }
 0x336   :  { %v1288_v57 = vmul.f32 %v1286_v54, %v1283_v55 }
 0x337   :  { %v1289_v58 = vmul.f32 %v1284_v56, %v1283_v55 }
 0x339   :  { %1291 = vrot.lane.b32.xlu1 %v1289_v58, %s3320_s2 }
 0x3ab   :  { %v1292_v59 = vpop.permute.xlu1 %1291 }
 0x3ac   :  { %v1294_v60 = vadd.f32 %v1292_v59, %v1288_v57 }
 0x3ae   :  { %3206 = vtanh.f32 %v1294_v60  ;;  %v1389_v16 = vrot.slane %v1294_v60, 7 }
 0x3b8   :  { %v3207_v61 = vpop.eup %3206 }
 0x3b9   :  { %v1296_v62 = vmul.f32 %v3207_v61, %v1284_v56 }
 0x3bb   :  { %v1298_v0 = vrot.slane %v1296_v62, 1  ;;  %v1916_v32 = vsel %vm1915_vm4, %v3665_v40, %v1296_v62 }
 0x3bd   :  { %1299 = vrot.lane.b32.xlu0 %v1298_v0, %s3320_s2 }
 0x42f   :  { %v1300_v1 = vpop.permute.xlu0 %1299 }
 0x430   :  { %2881 = vmatmul.mubr.msk.f32.vlgmr.msra.gmra.mrb[54].mxu1 %vm1097_vm3, %v1300_v1 }
 0x431   :  { %2958 = vmatpush1.bf16.msra.mxu1 %v3397_v21  ;;  %1470 = vmatprep.mubr.f32.mxu1 %v3318_v3 }
 0x432   :  { %2960 = vmatprep.subr.bf16.mxu1 %v3400_v22 }
 0x435   :  { %2962 = vmatpush1.bf16.msra.mxu1 %v3420_v28 }
 0x436   :  { %2964 = vmatprep.subr.bf16.mxu1 %v3423_v29 }
 0x439   :  { %2966 = vmatpush1.bf16.msra.mxu1 %v3446_v36 }
 0x43a   :  { %2968 = vmatprep.subr.bf16.mxu1 %v3449_v37 }
 0x43d   :  { %2970 = vmatpush1.bf16.msra.mxu1 %v3465_v41 }
 0x43e   :  { %2972 = vmatprep.subr.bf16.mxu1 %v3380_v15 }
 0x503   :  { %v1369_v2 = vpop.f32.mrb[54].mxu1 }
 0x504   :  { %v1376_v4 = vrot.slane %v1369_v2, 6  ;;  %v1371_v7 = vpop.f32.mrb[55].mxu1 }
 0x505   :  { %v1377_v8 = vrot.slane %v1371_v7, 6 }
 0x506   :  { %v1380_v9 = vadd.f32 %v1376_v4, %v3600_v17 }
 0x507   :  { %v1381_v10 = vadd.f32 %v1377_v8, %v3603_v20 }
 0x508   :  { %3208 = vtanh.f32 %v1380_v9 }
 0x509   :  { %3210 = vtanh.f32 %v1381_v10 }
 0x512   :  { %v3209_v11 = vpop.eup %3208 }
 0x513   :  { %v3211_v12 = vpop.eup %3210  ;;  %v1384_v13 = vmul.f32 0.5, %v3209_v11 }
 0x514   :  { %v1385_v14 = vmul.f32 %v3211_v12, %v3656_v18 }
 0x515   :  { %v1386_v19 = vadd.f32 0.5, %v1384_v13 }
 0x516   :  { %v1387_v23 = vadd.f32 %v1385_v14, %v3658_v25 }
 0x517   :  { %v1391_v24 = vmul.f32 %v1389_v16, %v1386_v19 }
 0x518   :  { %v1392_v26 = vmul.f32 %v1387_v23, %v1386_v19 }
 0x51a   :  { %1394 = vrot.lane.b32.xlu1 %v1392_v26, %s3320_s2 }
 0x58c   :  { %v1395_v27 = vpop.permute.xlu1 %1394 }
 0x58d   :  { %v1397_v30 = vadd.f32 %v1395_v27, %v1391_v24 }
 0x58f   :  { %3212 = vtanh.f32 %v1397_v30  ;;  %v1492_v49 = vrot.slane %v1397_v30, 7 }
 0x599   :  { %v3213_v63 = vpop.eup %3212 }
 0x59a   :  { %v1399_v31 = vmul.f32 %v3213_v63, %v1387_v23 }
 0x59c   :  { %v1401_v33 = vrot.slane %v1399_v31, 2  ;;  %v1918_v34 = vsel %vm1917_vm5, %v1916_v32, %v1399_v31 }
 0x59e   :  { %1402 = vrot.lane.b32.xlu0 %v1401_v33, %s3320_s2 }
 0x610   :  { %v1403_v35 = vpop.permute.xlu0 %1402 }
 0x611   :  { %2882 = vmatmul.mubr.msk.f32.vlgmr.msra.gmra.mrb[56].mxu1 %vm1097_vm3, %v1403_v35 }
 0x612   :  { %2974 = vmatpush1.bf16.msra.mxu1 %v3397_v21  ;;  %1573 = vmatprep.mubr.f32.mxu1 %v3318_v3 }
 0x613   :  { %2976 = vmatprep.subr.bf16.mxu1 %v3400_v22 }
 0x616   :  { %2978 = vmatpush1.bf16.msra.mxu1 %v3420_v28 }
 0x617   :  { %2980 = vmatprep.subr.bf16.mxu1 %v3423_v29 }
 0x61a   :  { %2982 = vmatpush1.bf16.msra.mxu1 %v3446_v36 }
 0x61b   :  { %2984 = vmatprep.subr.bf16.mxu1 %v3449_v37 }
 0x61e   :  { %2986 = vmatpush1.bf16.msra.mxu1 %v3465_v41 }
 0x61f   :  { %2988 = vmatprep.subr.bf16.mxu1 %v3380_v15 }
 0x6e4   :  { %v1472_v38 = vpop.f32.mrb[56].mxu1 }
 0x6e5   :  { %v1479_v39 = vrot.slane %v1472_v38, 5  ;;  %v1474_v40 = vpop.f32.mrb[57].mxu1 }
 0x6e6   :  { %v1480_v42 = vrot.slane %v1474_v40, 5 }
 0x6e7   :  { %v1483_v43 = vadd.f32 %v1479_v39, %v3600_v17 }
 0x6e8   :  { %v1484_v44 = vadd.f32 %v1480_v42, %v3603_v20 }
 0x6e9   :  { %3214 = vtanh.f32 %v1483_v43 }
 0x6ea   :  { %3216 = vtanh.f32 %v1484_v44 }
 0x6f3   :  { %v3215_v45 = vpop.eup %3214 }
 0x6f4   :  { %v3217_v46 = vpop.eup %3216  ;;  %v1487_v47 = vmul.f32 0.5, %v3215_v45 }
 0x6f5   :  { %v1488_v48 = vmul.f32 %v3217_v46, %v3656_v18 }
 0x6f6   :  { %v1489_v50 = vadd.f32 0.5, %v1487_v47 }
 0x6f7   :  { %v1490_v51 = vadd.f32 %v1488_v48, %v3658_v25 }
 0x6f8   :  { %v1494_v52 = vmul.f32 %v1492_v49, %v1489_v50 }
 0x6f9   :  { %v1495_v53 = vmul.f32 %v1490_v51, %v1489_v50 }
 0x6fb   :  { %1497 = vrot.lane.b32.xlu1 %v1495_v53, %s3320_s2 }
 0x76d   :  { %v1498_v54 = vpop.permute.xlu1 %1497 }
 0x76e   :  { %v1500_v55 = vadd.f32 %v1498_v54, %v1494_v52 }
 0x770   :  { %3218 = vtanh.f32 %v1500_v55  ;;  %v1595_v11 = vrot.slane %v1500_v55, 7 }
 0x77a   :  { %v3219_v56 = vpop.eup %3218 }
 0x77b   :  { %v1502_v57 = vmul.f32 %v3219_v56, %v1490_v51 }
 0x77d   :  { %v1504_v58 = vrot.slane %v1502_v57, 3  ;;  %v1920_v59 = vsel %vm1919_vm6, %v1918_v34, %v1502_v57 }
 0x77f   :  { %1505 = vrot.lane.b32.xlu0 %v1504_v58, %s3320_s2 }
 0x7f1   :  { %v1506_v60 = vpop.permute.xlu0 %1505 }
 0x7f2   :  { %2883 = vmatmul.mubr.msk.f32.vlgmr.msra.gmra.mrb[58].mxu1 %vm1097_vm3, %v1506_v60 }
 0x7f3   :  { %2990 = vmatpush1.bf16.msra.mxu1 %v3397_v21  ;;  %1676 = vmatprep.mubr.f32.mxu1 %v3318_v3 }
 0x7f4   :  { %2992 = vmatprep.subr.bf16.mxu1 %v3400_v22 }
 0x7f7   :  { %2994 = vmatpush1.bf16.msra.mxu1 %v3420_v28 }
 0x7f8   :  { %2996 = vmatprep.subr.bf16.mxu1 %v3423_v29 }
 0x7fb   :  { %2998 = vmatpush1.bf16.msra.mxu1 %v3446_v36 }
 0x7fc   :  { %3000 = vmatprep.subr.bf16.mxu1 %v3449_v37 }
 0x7ff   :  { %3002 = vmatpush1.bf16.msra.mxu1 %v3465_v41 }
 0x800   :  { %3004 = vmatprep.subr.bf16.mxu1 %v3380_v15 }
 0x8c5   :  { %v1575_v61 = vpop.f32.mrb[58].mxu1 }
 0x8c6   :  { %v1582_v62 = vrot.slane %v1575_v61, 4  ;;  %v1577_v0 = vpop.f32.mrb[59].mxu1 }
 0x8c7   :  { %v1583_v1 = vrot.slane %v1577_v0, 4 }
 0x8c8   :  { %v1586_v2 = vadd.f32 %v1582_v62, %v3600_v17 }
 0x8c9   :  { %v1587_v4 = vadd.f32 %v1583_v1, %v3603_v20 }
 0x8ca   :  { %3220 = vtanh.f32 %v1586_v2 }
 0x8cb   :  { %3222 = vtanh.f32 %v1587_v4 }
 0x8d4   :  { %v3221_v7 = vpop.eup %3220 }
 0x8d5   :  { %v3223_v8 = vpop.eup %3222  ;;  %v1590_v9 = vmul.f32 0.5, %v3221_v7 }
 0x8d6   :  { %v1591_v10 = vmul.f32 %v3223_v8, %v3656_v18 }
 0x8d7   :  { %v1592_v12 = vadd.f32 0.5, %v1590_v9 }
 0x8d8   :  { %v1593_v13 = vadd.f32 %v1591_v10, %v3658_v25 }
 0x8d9   :  { %v1597_v14 = vmul.f32 %v1595_v11, %v1592_v12 }
 0x8da   :  { %v1598_v16 = vmul.f32 %v1593_v13, %v1592_v12 }
 0x8dc   :  { %1600 = vrot.lane.b32.xlu1 %v1598_v16, %s3320_s2 }
 0x94e   :  { %v1601_v19 = vpop.permute.xlu1 %1600 }
 0x94f   :  { %v1603_v23 = vadd.f32 %v1601_v19, %v1597_v14  ;;  %v21_v19 = vld [vmem:[%s4345_s0 + $0x20] sm:$0xff] }
 0x951   :  { %3224 = vtanh.f32 %v1603_v23  ;;  %v1698_v44 = vrot.slane %v1603_v23, 7 }
 0x95b   :  { %v3225_v24 = vpop.eup %3224 }
 0x95c   :  { %v1605_v26 = vmul.f32 %v3225_v24, %v1593_v13  ;;  %v20_v13 = vld [vmem:[%s4345_s0 + $0x18] sm:$0xff] }
 0x95e   :  { %v1607_v27 = vrot.slane %v1605_v26, 4  ;;  %v1922_v30 = vsel %vm1921_vm7, %v1920_v59, %v1605_v26  ;;  %v22_v26 = vld [vmem:[%s4345_s0 + $0x28] sm:$0xff] }
 0x960   :  { %1608 = vrot.lane.b32.xlu0 %v1607_v27, %s3320_s2  ;;  %v23_v27 = vld [vmem:[%s4345_s0 + $0x30] sm:$0xff] }
 0x9d2   :  { %v1609_v63 = vpop.permute.xlu0 %1608 }
 0x9d3   :  { %2884 = vmatmul.mubr.msk.f32.vlgmr.msra.gmra.mrb[60].mxu1 %vm1097_vm3, %v1609_v63  ;;  %v25_v63 = vld [vmem:[%s4345_s0 + $0x40] sm:$0xff] }
 0x9d4   :  { %3006 = vmatpush1.bf16.msra.mxu1 %v3397_v21  ;;  %1779 = vmatprep.mubr.f32.mxu1 %v3318_v3 }
 0x9d5   :  { %3008 = vmatprep.subr.bf16.mxu1 %v3400_v22 }
 0x9d8   :  { %3010 = vmatpush1.bf16.msra.mxu1 %v3420_v28 }
 0x9d9   :  { %3012 = vmatprep.subr.bf16.mxu1 %v3423_v29 }
 0x9dc   :  { %3014 = vmatpush1.bf16.msra.mxu1 %v3446_v36 }
 0x9dd   :  { %3016 = vmatprep.subr.bf16.mxu1 %v3449_v37 }
 0x9e0   :  { %3018 = vmatpush1.bf16.msra.mxu1 %v3465_v41 }
 0x9e1   :  { %3020 = vmatprep.subr.bf16.mxu1 %v3380_v15 }
 0xaa6   :  { %v1678_v31 = vpop.f32.mrb[60].mxu1 }
 0xaa7   :  { %v1685_v32 = vrot.slane %v1678_v31, 3  ;;  %v1680_v33 = vpop.f32.mrb[61].mxu1  ;;  %v26_v31 = vld [vmem:[%s4345_s0 + $0x48] sm:$0xff] }
 0xaa8   :  { %v1686_v34 = vrot.slane %v1680_v33, 3  ;;  %v28_v33 = vld [vmem:[%s4345_s0 + $0x58] sm:$0xff] }
 0xaa9   :  { %v1689_v35 = vadd.f32 %v1685_v32, %v3600_v17  ;;  %v27_v32 = vld [vmem:[%s4345_s0 + $0x50] sm:$0xff] }
 0xaaa   :  { %v1690_v38 = vadd.f32 %v1686_v34, %v3603_v20  ;;  %v29_v34 = vld [vmem:[%s4345_s0 + $0x60] sm:$0xff] }
 0xaab   :  { %3226 = vtanh.f32 %v1689_v35  ;;  %v30_v35 = vld [vmem:[%s4345_s0 + $0x68] sm:$0xff] }
 0xaac   :  { %3228 = vtanh.f32 %v1690_v38  ;;  %v31_v38 = vld [vmem:[%s4345_s0 + $0x70] sm:$0xff] }
 0xab5   :  { %v3227_v39 = vpop.eup %3226 }
 0xab6   :  { %v3229_v40 = vpop.eup %3228  ;;  %v1693_v42 = vmul.f32 0.5, %v3227_v39  ;;  %v32_v39 = vld [vmem:[%s4345_s0 + $0x78] sm:$0xff] }
 0xab7   :  { %v1694_v43 = vmul.f32 %v3229_v40, %v3656_v18  ;;  %v33_v40 = vld [vmem:[%s4345_s0 + $0x80] sm:$0xff] }
 0xab8   :  { %v1695_v45 = vadd.f32 0.5, %v1693_v42  ;;  %v34_v42 = vld [vmem:[%s4345_s0 + $0x88] sm:$0xff] }
 0xab9   :  { %v1696_v46 = vadd.f32 %v1694_v43, %v3658_v25  ;;  %v35_v43 = vld [vmem:[%s4345_s0 + $0x90] sm:$0xff] }
 0xaba   :  { %v1700_v47 = vmul.f32 %v1698_v44, %v1695_v45  ;;  %v36_v44 = vld [vmem:[%s4345_s0 + $0x98] sm:$0xff] }
 0xabb   :  { %v1701_v48 = vmul.f32 %v1696_v46, %v1695_v45  ;;  %v37_v45 = vld [vmem:[%s4345_s0 + $0xa0] sm:$0xff] }
 0xabd   :  { %1703 = vrot.lane.b32.xlu1 %v1701_v48, %s3320_s2  ;;  %v40_v48 = vld [vmem:[%s4345_s0 + $0xb8] sm:$0xff] }
 0xb2f   :  { %v1704_v49 = vpop.permute.xlu1 %1703 }
 0xb30   :  { %v1706_v50 = vadd.f32 %v1704_v49, %v1700_v47  ;;  %v39_v47 = vld [vmem:[%s4345_s0 + $0xb0] sm:$0xff]  ;;  %v41_v49 = vld [vmem:[%s4345_s0 + $0xc0] sm:$0xff] }
 0xb32   :  { %3230 = vtanh.f32 %v1706_v50  ;;  %v1801_v4 = vrot.slane %v1706_v50, 7  ;;  %v42_v50 = vld [vmem:[%s4345_s0 + $0xc8] sm:$0xff] }
 0xb3c   :  { %v3231_v51 = vpop.eup %3230 }
 0xb3d   :  { %v1708_v52 = vmul.f32 %v3231_v51, %v1696_v46  ;;  %v38_v46 = vld [vmem:[%s4345_s0 + $0xa8] sm:$0xff]  ;;  %v43_v51 = vld [vmem:[%s4345_s0 + $0xd0] sm:$0xff] }
 0xb3f   :  { %v1710_v53 = vrot.slane %v1708_v52, 5  ;;  %v1924_v54 = vsel %vm1923_vm8, %v1922_v30, %v1708_v52  ;;  %v24_v30 = vld [vmem:[%s4345_s0 + $0x38] sm:$0xff] }
 0xb40   :  { %v44_v52 = vld [vmem:[%s4345_s0 + $0xd8] sm:$0xff] }
 0xb41   :  { %1711 = vrot.lane.b32.xlu0 %v1710_v53, %s3320_s2  ;;  %v45_v53 = vld [vmem:[%s4345_s0 + $0xe0] sm:$0xff] }
 0xbb3   :  { %v1712_v55 = vpop.permute.xlu0 %1711 }
 0xbb4   :  { %2885 = vmatmul.mubr.msk.f32.vlgmr.msra.gmra.mrb[62].mxu1 %vm1097_vm3, %v1712_v55  ;;  %v47_v55 = vld [vmem:[%s4345_s0 + $0xf0] sm:$0xff] }
 0xbb5   :  { %3022 = vmatpush1.bf16.msra.mxu1 %v3397_v21  ;;  %1882 = vmatprep.mubr.f32.mxu1 %v3318_v3 }
 0xbb6   :  { %3024 = vmatprep.subr.bf16.mxu1 %v3400_v22 }
 0xbb9   :  { %3026 = vmatpush1.bf16.msra.mxu1 %v3420_v28 }
 0xbba   :  { %3028 = vmatprep.subr.bf16.mxu1 %v3423_v29 }
 0xbbd   :  { %3030 = vmatpush1.bf16.msra.mxu1 %v3446_v36 }
 0xbbe   :  { %3032 = vmatprep.subr.bf16.mxu1 %v3449_v37 }
 0xbc1   :  { %3034 = vmatpush1.bf16.msra.mxu1 %v3465_v41 }
 0xc87   :  { %v1781_v56 = vpop.f32.mrb[62].mxu1 }
 0xc88   :  { %v1788_v57 = vrot.slane %v1781_v56, 2  ;;  %v1783_v58 = vpop.f32.mrb[63].mxu1  ;;  %v48_v56 = vld [vmem:[%s4345_s0 + $0xf8] sm:$0xff] }
 0xc89   :  { %v1789_v59 = vrot.slane %v1783_v58, 2  ;;  %v50_v58 = vld [vmem:[%s4345_s0 + $0x108] sm:$0xff] }
 0xc8a   :  { %v1792_v60 = vadd.f32 %v1788_v57, %v3600_v17  ;;  %v18_v17 = vld [vmem:[%s4345_s0 + $0x8] sm:$0xff]  ;;  %v49_v57 = vld [vmem:[%s4345_s0 + $0x100] sm:$0xff] }
 0xc8b   :  { %v1793_v61 = vadd.f32 %v1789_v59, %v3603_v20  ;;  %2800 = vmatmul.mubr.msk.f32.gmra.mrb[2].mxu0 %vm117_vm0, %v18_v17  ;;  %v19_v20 = vld [vmem:[%s4345_s0 + $0x10] sm:$0xff] }
 0xc8c   :  { %3232 = vtanh.f32 %v1792_v60  ;;  %434 = vmatprep.mubr.f32.mxu0 %v3318_v3  ;;  %v51_v60 = vld [vmem:[%s4345_s0 + $0x110] sm:$0xff] }
 0xc8d   :  { %3234 = vtanh.f32 %v1793_v61  ;;  %v52_v61 = vld [vmem:[%s4345_s0 + $0x118] sm:$0xff]  ;;  %v63_v17 = vld [vmem:[%s4345_s0 + $0x170] sm:$0xff] }
 0xc8f   :  { %2801 = vmatmul.mubr.msk.f32.gmra.mrb[4].mxu0 %vm117_vm0, %v19_v20  ;;  %v64_v20 = vld [vmem:[%s4345_s0 + $0x178] sm:$0xff] }
 0xc90   :  { %440 = vmatprep.mubr.f32.mxu0 %v3318_v3 }
 0xc93   :  { %2802 = vmatmul.mubr.msk.f32.gmra.mrb[6].mxu0 %vm117_vm0, %v20_v13 }
 0xc94   :  { %446 = vmatprep.mubr.f32.mxu0 %v3318_v3 }
 0xc96   :  { %v3233_v62 = vpop.eup %3232 }
 0xc97   :  { %v3235_v0 = vpop.eup %3234  ;;  %v1796_v1 = vmul.f32 0.5, %v3233_v62  ;;  %2803 = vmatmul.mubr.msk.f32.gmra.mrb[8].mxu0 %vm117_vm0, %v21_v19  ;;  %v53_v62 = vld [vmem:[%s4345_s0 + $0x120] sm:$0xff] }
 0xc98   :  { %v1797_v2 = vmul.f32 %v3235_v0, %v3656_v18  ;;  %452 = vmatprep.mubr.f32.mxu0 %v3318_v3  ;;  %v54_v0 = vld [vmem:[%s4345_s0 + $0x128] sm:$0xff] }
 0xc99   :  { %v1798_v7 = vadd.f32 0.5, %v1796_v1  ;;  %v55_v1 = vld [vmem:[%s4345_s0 + $0x130] sm:$0xff] }
 0xc9a   :  { %v1799_v8 = vadd.f32 %v1797_v2, %v3658_v25  ;;  %v56_v2 = vld [vmem:[%s4345_s0 + $0x138] sm:$0xff] }
 0xc9b   :  { %v1803_v9 = vmul.f32 %v1801_v4, %v1798_v7  ;;  %2804 = vmatmul.mubr.msk.f32.gmra.mrb[10].mxu0 %vm117_vm0, %v22_v26  ;;  %v57_v4 = vld [vmem:[%s4345_s0 + $0x140] sm:$0xff] }
 0xc9c   :  { %v1804_v10 = vmul.f32 %v1799_v8, %v1798_v7  ;;  %458 = vmatprep.mubr.f32.mxu0 %v3318_v3  ;;  %v58_v7 = vld [vmem:[%s4345_s0 + $0x148] sm:$0xff]  ;;  %v65_v26 = vld [vmem:[%s4345_s0 + $0x180] sm:$0xff] }
 0xc9e   :  { %1806 = vrot.lane.b32.xlu1 %v1804_v10, %s3320_s2  ;;  %v61_v10 = vld [vmem:[%s4345_s0 + $0x160] sm:$0xff] }
 0xc9f   :  { %2805 = vmatmul.mubr.msk.f32.gmra.mrb[12].mxu0 %vm117_vm0, %v23_v27 }
 0xca0   :  { %464 = vmatprep.mubr.f32.mxu0 %v3318_v3 }
 0xca3   :  { %2806 = vmatmul.mubr.msk.f32.gmra.mrb[14].mxu0 %vm117_vm0, %v24_v30 }
 0xca4   :  { %470 = vmatprep.mubr.f32.mxu0 %v3318_v3 }
 0xca7   :  { %2807 = vmatmul.mubr.msk.f32.gmra.mrb[16].mxu0 %vm117_vm0, %v25_v63 }
 0xca8   :  { %476 = vmatprep.mubr.f32.mxu0 %v3318_v3 }
 0xcab   :  { %2808 = vmatmul.mubr.msk.f32.gmra.mrb[18].mxu0 %vm117_vm0, %v26_v31 }
 0xcac   :  { %482 = vmatprep.mubr.f32.mxu0 %v3318_v3 }
 0xcaf   :  { %2809 = vmatmul.mubr.msk.f32.gmra.mrb[20].mxu0 %vm117_vm0, %v27_v32 }
 0xcb0   :  { %488 = vmatprep.mubr.f32.mxu0 %v3318_v3 }
 0xcb3   :  { %2810 = vmatmul.mubr.msk.f32.gmra.mrb[22].mxu0 %vm117_vm0, %v28_v33 }
 0xcb4   :  { %494 = vmatprep.mubr.f32.mxu0 %v3318_v3 }
 0xcb7   :  { %2811 = vmatmul.mubr.msk.f32.gmra.mrb[24].mxu0 %vm117_vm0, %v29_v34 }
 0xcb8   :  { %500 = vmatprep.mubr.f32.mxu0 %v3318_v3 }
 0xcbb   :  { %2812 = vmatmul.mubr.msk.f32.gmra.mrb[26].mxu0 %vm117_vm0, %v30_v35 }
 0xcbc   :  { %506 = vmatprep.mubr.f32.mxu0 %v3318_v3 }
 0xcbf   :  { %2813 = vmatmul.mubr.msk.f32.gmra.mrb[28].mxu0 %vm117_vm0, %v31_v38  ;;  %v66_v38 = vld [vmem:[%s4345_s0 + $0x188] sm:$0xff] }
 0xcc0   :  { %512 = vmatprep.mubr.f32.mxu0 %v3318_v3 }
 0xcc3   :  { %2814 = vmatmul.mubr.msk.f32.gmra.mrb[30].mxu0 %vm117_vm0, %v32_v39 }
 0xcc4   :  { %518 = vmatprep.mubr.f32.mxu0 %v3318_v3 }
 0xcc7   :  { %2815 = vmatmul.mubr.msk.f32.gmra.mrb[32].mxu0 %vm117_vm0, %v33_v40 }
 0xcc8   :  { %524 = vmatprep.mubr.f32.mxu0 %v3318_v3 }
 0xccb   :  { %2816 = vmatmul.mubr.msk.f32.gmra.mrb[34].mxu0 %vm117_vm0, %v34_v42 }
 0xccc   :  { %530 = vmatprep.mubr.f32.mxu0 %v3318_v3 }
 0xccf   :  { %2817 = vmatmul.mubr.msk.f32.gmra.mrb[36].mxu0 %vm117_vm0, %v35_v43 }
 0xcd0   :  { %536 = vmatprep.mubr.f32.mxu0 %v3318_v3 }
 0xcd3   :  { %2818 = vmatmul.mubr.msk.f32.gmra.mrb[38].mxu0 %vm117_vm0, %v36_v44 }
 0xcd4   :  { %542 = vmatprep.mubr.f32.mxu0 %v3318_v3 }
 0xcd7   :  { %2819 = vmatmul.mubr.msk.f32.gmra.mrb[40].mxu0 %vm117_vm0, %v37_v45 }
 0xcd8   :  { %548 = vmatprep.mubr.f32.mxu0 %v3318_v3 }
 0xcdb   :  { %2820 = vmatmul.mubr.msk.f32.gmra.mrb[42].mxu0 %vm117_vm0, %v38_v46 }
 0xcdc   :  { %554 = vmatprep.mubr.f32.mxu0 %v3318_v3 }
 0xcdf   :  { %2821 = vmatmul.mubr.msk.f32.gmra.mrb[44].mxu0 %vm117_vm0, %v39_v47 }
 0xce0   :  { %560 = vmatprep.mubr.f32.mxu0 %v3318_v3 }
 0xce3   :  { %2822 = vmatmul.mubr.msk.f32.gmra.mrb[46].mxu0 %vm117_vm0, %v40_v48  ;;  %v67_v48 = vld [vmem:[%s4345_s0 + $0x190] sm:$0xff] }
 0xce4   :  { %566 = vmatprep.mubr.f32.mxu0 %v3318_v3 }
 0xce7   :  { %2823 = vmatmul.mubr.msk.f32.gmra.mrb[48].mxu0 %vm117_vm0, %v41_v49 }
 0xce8   :  { %572 = vmatprep.mubr.f32.mxu0 %v3318_v3 }
 0xceb   :  { %2824 = vmatmul.mubr.msk.f32.gmra.mrb[50].mxu0 %vm117_vm0, %v42_v50 }
 0xcec   :  { %578 = vmatprep.mubr.f32.mxu0 %v3318_v3 }
 0xcef   :  { %2825 = vmatmul.mubr.msk.f32.gmra.mrb[52].mxu0 %vm117_vm0, %v43_v51 }
 0xcf0   :  { %584 = vmatprep.mubr.f32.mxu0 %v3318_v3 }
 0xcf3   :  { %2826 = vmatmul.mubr.msk.f32.gmra.mrb[54].mxu0 %vm117_vm0, %v44_v52 }
 0xcf4   :  { %590 = vmatprep.mubr.f32.mxu0 %v3318_v3 }
 0xcf7   :  { %2827 = vmatmul.mubr.msk.f32.gmra.mrb[56].mxu0 %vm117_vm0, %v45_v53 }
 0xcf8   :  { %596 = vmatprep.mubr.f32.mxu0 %v3318_v3 }
 0xd10   :  { %v1807_v11 = vpop.permute.xlu1 %1806 }
 0xd11   :  { %v3769_v12 = vadd.f32 %v1807_v11, %v1803_v9  ;;  %v60_v9 = vld [vmem:[%s4345_s0 + $0x158] sm:$0xff]  ;;  %v62_v11 = vld [vmem:[%s4345_s0 + $0x168] sm:$0xff] }
 0xd13   :  { %3236 = vtanh.f32 %v3769_v12 }
 0xd1d   :  { %v3237_v14 = vpop.eup %3236 }
 0xd1e   :  { %v1811_v16 = vmul.f32 %v3237_v14, %v1799_v8  ;;  %v59_v8 = vld [vmem:[%s4345_s0 + $0x150] sm:$0xff] }
 0xd20   :  { %v1813_v23 = vrot.slane %v1811_v16, 6  ;;  %v3791_v24 = vsel %vm1925_vm9, %v1924_v54, %v1811_v16  ;;  %v46_v54 = vld [vmem:[%s4345_s0 + $0xe8] sm:$0xff] }
 0xd21   :  { %2828 = vmatmul.mubr.msk.f32.gmra.mrb[58].mxu0 %vm117_vm0, %v46_v54 }
 0xd22   :  { %1814 = vrot.lane.b32.xlu0 %v1813_v23, %s3320_s2  ;;  %602 = vmatprep.mubr.f32.mxu0 %v3318_v3 }
 0xd25   :  { %2829 = vmatmul.mubr.msk.f32.gmra.mrb[60].mxu0 %vm117_vm0, %v47_v55 }
 0xd26   :  { %608 = vmatprep.mubr.f32.mxu0 %v3318_v3 }
 0xd29   :  { %2830 = vmatmul.mubr.msk.f32.gmra.mrb[62].mxu0 %vm117_vm0, %v48_v56 }
 0xd2a   :  { %614 = vmatprep.mubr.f32.mxu0 %v3318_v3 }
 0xd2d   :  { %2831 = vmatmul.mubr.msk.f32.gmra.mrb[64].mxu0 %vm117_vm0, %v49_v57  ;;  %v68_v57 = vld [vmem:[%s4345_s0 + $0x198] sm:$0xff] }
 0xd2e   :  { %620 = vmatprep.mubr.f32.mxu0 %v3318_v3 }
 0xd31   :  { %2832 = vmatmul.mubr.msk.f32.gmra.mrb[66].mxu0 %vm117_vm0, %v50_v58 }
 0xd32   :  { %626 = vmatprep.mubr.f32.mxu0 %v3318_v3 }
 0xd35   :  { %2833 = vmatmul.mubr.msk.f32.gmra.mrb[68].mxu0 %vm117_vm0, %v51_v60 }
 0xd36   :  { %632 = vmatprep.mubr.f32.mxu0 %v3318_v3 }
 0xd39   :  { %2834 = vmatmul.mubr.msk.f32.gmra.mrb[70].mxu0 %vm117_vm0, %v52_v61 }
 0xd3a   :  { %638 = vmatprep.mubr.f32.mxu0 %v3318_v3 }
 0xd3d   :  { %2835 = vmatmul.mubr.msk.f32.gmra.mrb[72].mxu0 %vm117_vm0, %v53_v62 }
 0xd3e   :  { %644 = vmatprep.mubr.f32.mxu0 %v3318_v3 }
 0xd41   :  { %2836 = vmatmul.mubr.msk.f32.gmra.mrb[74].mxu0 %vm117_vm0, %v54_v0 }
 0xd42   :  { %650 = vmatprep.mubr.f32.mxu0 %v3318_v3 }
 0xd45   :  { %2837 = vmatmul.mubr.msk.f32.gmra.mrb[76].mxu0 %vm117_vm0, %v55_v1 }
 0xd46   :  { %656 = vmatprep.mubr.f32.mxu0 %v3318_v3 }
 0xd49   :  { %2838 = vmatmul.mubr.msk.f32.gmra.mrb[78].mxu0 %vm117_vm0, %v56_v2 }
 0xd4a   :  { %662 = vmatprep.mubr.f32.mxu0 %v3318_v3 }
 0xd4d   :  { %2839 = vmatmul.mubr.msk.f32.gmra.mrb[80].mxu0 %vm117_vm0, %v57_v4  ;;  %v69_v4 = vld [vmem:[%s4345_s0 + $0x1a0] sm:$0xff] }
 0xd4e   :  { %668 = vmatprep.mubr.f32.mxu0 %v3318_v3 }
 0xd51   :  { %2840 = vmatmul.mubr.msk.f32.gmra.mrb[82].mxu0 %vm117_vm0, %v58_v7 }
 0xd52   :  { %674 = vmatprep.mubr.f32.mxu0 %v3318_v3 }
 0xd55   :  { %2841 = vmatmul.mubr.msk.f32.gmra.mrb[84].mxu0 %vm117_vm0, %v59_v8 }
 0xd56   :  { %680 = vmatprep.mubr.f32.mxu0 %v3318_v3 }
 0xd59   :  { %2842 = vmatmul.mubr.msk.f32.gmra.mrb[86].mxu0 %vm117_vm0, %v60_v9 }
 0xd5a   :  { %686 = vmatprep.mubr.f32.mxu0 %v3318_v3 }
 0xd5d   :  { %2843 = vmatmul.mubr.msk.f32.gmra.mrb[88].mxu0 %vm117_vm0, %v61_v10 }
 0xd5e   :  { %692 = vmatprep.mubr.f32.mxu0 %v3318_v3  ;;  %v430_v13 = vpop.f32.mrb[2].mxu0 }
 0xd5f   :  { %v431_v14 = vadd.f32 %v430_v13, %v3591_v5  ;;  %v432_v16 = vpop.f32.mrb[3].mxu0 }
 0xd60   :  { %v433_v19 = vadd.f32 %v432_v16, %v3593_v6 }
 0xd61   :  { %2844 = vmatmul.mubr.msk.f32.gmra.mrb[90].mxu0 %vm117_vm0, %v62_v11  ;;  %905 = vst [vmem:[#allocation2 + $0x10] sm:$0xff] %v431_v14  ;;  %v70_v14 = vld [vmem:[%s4345_s0 + $0x1a8] sm:$0xff] }
 0xd62   :  { %698 = vmatprep.mubr.f32.mxu0 %v3318_v3  ;;  %v436_v23 = vpop.f32.mrb[4].mxu0  ;;  %906 = vst [vmem:[#allocation2 + $0x18] sm:$0xff] %v433_v19 }
 0xd63   :  { %v437_v27 = vadd.f32 %v436_v23, %v3591_v5  ;;  %v438_v30 = vpop.f32.mrb[5].mxu0 }
 0xd64   :  { %v439_v63 = vadd.f32 %v438_v30, %v3593_v6 }
 0xd65   :  { %2845 = vmatmul.mubr.msk.f32.gmra.mrb[92].mxu0 %vm117_vm0, %v63_v17  ;;  %907 = vst [vmem:[#allocation2 + $0x20] sm:$0xff] %v437_v27  ;;  %v71_v27 = vld [vmem:[%s4345_s0 + $0x1b0] sm:$0xff] }
 0xd66   :  { %704 = vmatprep.mubr.f32.mxu0 %v3318_v3  ;;  %v442_v31 = vpop.f32.mrb[6].mxu0  ;;  %908 = vst [vmem:[#allocation2 + $0x28] sm:$0xff] %v439_v63 }
 0xd67   :  { %v443_v32 = vadd.f32 %v442_v31, %v3591_v5  ;;  %v444_v33 = vpop.f32.mrb[7].mxu0 }
 0xd68   :  { %v445_v34 = vadd.f32 %v444_v33, %v3593_v6 }
 0xd69   :  { %2846 = vmatmul.mubr.msk.f32.gmra.mrb[94].mxu0 %vm117_vm0, %v64_v20  ;;  %909 = vst [vmem:[#allocation2 + $0x30] sm:$0xff] %v443_v32 }
 0xd6a   :  { %710 = vmatprep.mubr.f32.mxu0 %v3318_v3  ;;  %v448_v35 = vpop.f32.mrb[8].mxu0  ;;  %910 = vst [vmem:[#allocation2 + $0x38] sm:$0xff] %v445_v34 }
 0xd6b   :  { %v449_v39 = vadd.f32 %v448_v35, %v3591_v5  ;;  %v450_v40 = vpop.f32.mrb[9].mxu0 }
 0xd6c   :  { %v451_v42 = vadd.f32 %v450_v40, %v3593_v6 }
 0xd6d   :  { %2847 = vmatmul.mubr.msk.f32.gmra.mrb[96].mxu0 %vm117_vm0, %v65_v26  ;;  %911 = vst [vmem:[#allocation2 + $0x40] sm:$0xff] %v449_v39 }
 0xd6e   :  { %716 = vmatprep.mubr.f32.mxu0 %v3318_v3  ;;  %v454_v43 = vpop.f32.mrb[10].mxu0  ;;  %912 = vst [vmem:[#allocation2 + $0x48] sm:$0xff] %v451_v42 }
 0xd6f   :  { %v455_v44 = vadd.f32 %v454_v43, %v3591_v5  ;;  %v456_v45 = vpop.f32.mrb[11].mxu0 }
 0xd70   :  { %v457_v46 = vadd.f32 %v456_v45, %v3593_v6 }
 0xd71   :  { %2848 = vmatmul.mubr.msk.f32.gmra.mrb[98].mxu0 %vm117_vm0, %v66_v38  ;;  %913 = vst [vmem:[#allocation2 + $0x50] sm:$0xff] %v455_v44 }
 0xd72   :  { %v460_v47 = vpop.f32.mrb[12].mxu0  ;;  %722 = vmatprep.mubr.f32.mxu0 %v3318_v3  ;;  %914 = vst [vmem:[#allocation2 + $0x58] sm:$0xff] %v457_v46 }
 0xd73   :  { %v461_v49 = vadd.f32 %v460_v47, %v3591_v5  ;;  %v462_v50 = vpop.f32.mrb[13].mxu0 }
 0xd74   :  { %v463_v51 = vadd.f32 %v462_v50, %v3593_v6 }
 0xd75   :  { %915 = vst [vmem:[#allocation2 + $0x60] sm:$0xff] %v461_v49  ;;  %2849 = vmatmul.mubr.msk.f32.gmra.mrb[100].mxu0 %vm117_vm0, %v67_v48 }
 0xd76   :  { %v466_v52 = vpop.f32.mrb[14].mxu0  ;;  %916 = vst [vmem:[#allocation2 + $0x68] sm:$0xff] %v463_v51  ;;  %728 = vmatprep.mubr.f32.mxu0 %v3318_v3 }
 0xd77   :  { %v467_v53 = vadd.f32 %v466_v52, %v3591_v5  ;;  %v468_v54 = vpop.f32.mrb[15].mxu0 }
 0xd78   :  { %v469_v55 = vadd.f32 %v468_v54, %v3593_v6 }
 0xd79   :  { %917 = vst [vmem:[#allocation2 + $0x70] sm:$0xff] %v467_v53  ;;  %2850 = vmatmul.mubr.msk.f32.gmra.mrb[102].mxu0 %vm117_vm0, %v68_v57 }
 0xd7a   :  { %v472_v56 = vpop.f32.mrb[16].mxu0  ;;  %918 = vst [vmem:[#allocation2 + $0x78] sm:$0xff] %v469_v55  ;;  %734 = vmatprep.mubr.f32.mxu0 %v3318_v3 }
 0xd7b   :  { %v473_v58 = vadd.f32 %v472_v56, %v3591_v5 }
 0xd7d   :  { %919 = vst [vmem:[#allocation2 + $0x80] sm:$0xff] %v473_v58  ;;  %2851 = vmatmul.mubr.msk.f32.gmra.mrb[104].mxu0 %vm117_vm0, %v69_v4 }
 0xd7e   :  { %740 = vmatprep.mubr.f32.mxu0 %v3318_v3 }
 0xd81   :  { %2852 = vmatmul.mubr.msk.f32.gmra.mrb[106].mxu0 %vm117_vm0, %v70_v14 }
 0xd82   :  { %746 = vmatprep.mubr.f32.mxu0 %v3318_v3 }
 0xd85   :  { %2853 = vmatmul.mubr.msk.f32.gmra.mrb[108].mxu0 %vm117_vm0, %v71_v27 }
 0xd94   :  { %v1815_v59 = vpop.permute.xlu0 %1814 }
 0xd95   :  { %2886 = vmatmul.mubr.msk.f32.vlgmr.msra.gmra.mrb[64].mxu1 %vm1097_vm3, %v1815_v59  ;;  %v474_v59 = vpop.f32.mrb[17].mxu0 }
 0xd96   :  { %v475_v60 = vadd.f32 %v474_v59, %v3593_v6  ;;  %v478_v61 = vpop.f32.mrb[18].mxu0 }
 0xd97   :  { %v479_v62 = vadd.f32 %v478_v61, %v3591_v5  ;;  %v480_v0 = vpop.f32.mrb[19].mxu0 }
 0xd98   :  { %920 = vst [vmem:[#allocation2 + $0x88] sm:$0xff] %v475_v60  ;;  %v481_v1 = vadd.f32 %v480_v0, %v3593_v6  ;;  %v484_v2 = vpop.f32.mrb[20].mxu0 }
 0xd99   :  { %921 = vst [vmem:[#allocation2 + $0x90] sm:$0xff] %v479_v62  ;;  %v485_v7 = vadd.f32 %v484_v2, %v3591_v5  ;;  %v486_v8 = vpop.f32.mrb[21].mxu0 }
 0xd9a   :  { %922 = vst [vmem:[#allocation2 + $0x98] sm:$0xff] %v481_v1  ;;  %v487_v9 = vadd.f32 %v486_v8, %v3593_v6  ;;  %v490_v10 = vpop.f32.mrb[22].mxu0 }
 0xd9b   :  { %923 = vst [vmem:[#allocation2 + $0xa0] sm:$0xff] %v485_v7  ;;  %v491_v11 = vadd.f32 %v490_v10, %v3591_v5  ;;  %v492_v17 = vpop.f32.mrb[23].mxu0 }
 0xd9c   :  { %924 = vst [vmem:[#allocation2 + $0xa8] sm:$0xff] %v487_v9  ;;  %v493_v20 = vadd.f32 %v492_v17, %v3593_v6  ;;  %v496_v13 = vpop.f32.mrb[24].mxu0  ;;  %v3244_v17 = vld [vmem:[#allocation2] sm:$0xff] }
 0xd9d   :  { %925 = vst [vmem:[#allocation2 + $0xb0] sm:$0xff] %v491_v11  ;;  %v497_v16 = vadd.f32 %v496_v13, %v3591_v5  ;;  %v498_v19 = vpop.f32.mrb[25].mxu0  ;;  %v3245_v13 = vld [vmem:[#allocation2 + $0x8] sm:$0xff] }
 0xd9e   :  { %926 = vst [vmem:[#allocation2 + $0xb8] sm:$0xff] %v493_v20  ;;  %v499_v23 = vadd.f32 %v498_v19, %v3593_v6  ;;  %v502_v26 = vpop.f32.mrb[26].mxu0 }
 0xd9f   :  { %927 = vst [vmem:[#allocation2 + $0xc0] sm:$0xff] %v497_v16  ;;  %v503_v30 = vadd.f32 %v502_v26, %v3591_v5  ;;  %v504_v63 = vpop.f32.mrb[27].mxu0 }
 0xda0   :  { %928 = vst [vmem:[#allocation2 + $0xc8] sm:$0xff] %v499_v23  ;;  %v505_v31 = vadd.f32 %v504_v63, %v3593_v6  ;;  %v508_v32 = vpop.f32.mrb[28].mxu0 }
 0xda1   :  { %929 = vst [vmem:[#allocation2 + $0xd0] sm:$0xff] %v503_v30  ;;  %v509_v33 = vadd.f32 %v508_v32, %v3591_v5  ;;  %v510_v34 = vpop.f32.mrb[29].mxu0 }
 0xda2   :  { %930 = vst [vmem:[#allocation2 + $0xd8] sm:$0xff] %v505_v31  ;;  %v511_v35 = vadd.f32 %v510_v34, %v3593_v6  ;;  %v514_v3 = vpop.f32.mrb[30].mxu0 }
 0xda3   :  { %931 = vst [vmem:[#allocation2 + $0xe0] sm:$0xff] %v509_v33  ;;  %v515_v38 = vadd.f32 %v514_v3, %v3591_v5  ;;  %v516_v39 = vpop.f32.mrb[31].mxu0 }
 0xda4   :  { %932 = vst [vmem:[#allocation2 + $0xe8] sm:$0xff] %v511_v35  ;;  %v517_v40 = vadd.f32 %v516_v39, %v3593_v6  ;;  %v520_v42 = vpop.f32.mrb[32].mxu0 }
 0xda5   :  { %933 = vst [vmem:[#allocation2 + $0xf0] sm:$0xff] %v515_v38  ;;  %v521_v43 = vadd.f32 %v520_v42, %v3591_v5  ;;  %v522_v44 = vpop.f32.mrb[33].mxu0 }
 0xda6   :  { %934 = vst [vmem:[#allocation2 + $0xf8] sm:$0xff] %v517_v40  ;;  %v523_v45 = vadd.f32 %v522_v44, %v3593_v6  ;;  %v526_v46 = vpop.f32.mrb[34].mxu0 }
 0xda7   :  { %935 = vst [vmem:[#allocation2 + $0x100] sm:$0xff] %v521_v43  ;;  %v527_v47 = vadd.f32 %v526_v46, %v3591_v5  ;;  %v528_v48 = vpop.f32.mrb[35].mxu0  ;;  %v1904_v43 = vrot.slane %v3769_v12, 7 }
 0xda8   :  { %936 = vst [vmem:[#allocation2 + $0x108] sm:$0xff] %v523_v45  ;;  %v529_v49 = vadd.f32 %v528_v48, %v3593_v6  ;;  %v532_v50 = vpop.f32.mrb[36].mxu0 }
 0xda9   :  { %937 = vst [vmem:[#allocation2 + $0x110] sm:$0xff] %v527_v47  ;;  %v533_v51 = vadd.f32 %v532_v50, %v3591_v5  ;;  %v534_v52 = vpop.f32.mrb[37].mxu0 }
 0xdaa   :  { %938 = vst [vmem:[#allocation2 + $0x118] sm:$0xff] %v529_v49  ;;  %v535_v53 = vadd.f32 %v534_v52, %v3593_v6  ;;  %v538_v54 = vpop.f32.mrb[38].mxu0 }
 0xdab   :  { %939 = vst [vmem:[#allocation2 + $0x120] sm:$0xff] %v533_v51  ;;  %v539_v55 = vadd.f32 %v538_v54, %v3591_v5  ;;  %v540_v56 = vpop.f32.mrb[39].mxu0 }
 0xdac   :  { %940 = vst [vmem:[#allocation2 + $0x128] sm:$0xff] %v535_v53  ;;  %v541_v57 = vadd.f32 %v540_v56, %v3593_v6  ;;  %v544_v58 = vpop.f32.mrb[40].mxu0 }
 0xdad   :  { %941 = vst [vmem:[#allocation2 + $0x130] sm:$0xff] %v539_v55  ;;  %v545_v59 = vadd.f32 %v544_v58, %v3591_v5  ;;  %v546_v60 = vpop.f32.mrb[41].mxu0 }
 0xdae   :  { %942 = vst [vmem:[#allocation2 + $0x138] sm:$0xff] %v541_v57  ;;  %v547_v61 = vadd.f32 %v546_v60, %v3593_v6  ;;  %v550_v62 = vpop.f32.mrb[42].mxu0 }
 0xdaf   :  { %943 = vst [vmem:[#allocation2 + $0x140] sm:$0xff] %v545_v59  ;;  %v551_v0 = vadd.f32 %v550_v62, %v3591_v5  ;;  %v552_v1 = vpop.f32.mrb[43].mxu0 }
 0xdb0   :  { %944 = vst [vmem:[#allocation2 + $0x148] sm:$0xff] %v547_v61  ;;  %v553_v2 = vadd.f32 %v552_v1, %v3593_v6 }
 0xdb1   :  { %945 = vst [vmem:[#allocation2 + $0x150] sm:$0xff] %v551_v0 }
 0xdb2   :  { %946 = vst [vmem:[#allocation2 + $0x158] sm:$0xff] %v553_v2  ;;  %v556_v4 = vpop.f32.mrb[44].mxu0 }
 0xdb3   :  { %v557_v7 = vadd.f32 %v556_v4, %v3591_v5  ;;  %v558_v16 = vpop.f32.mrb[45].mxu0 }
 0xdb4   :  { %v559_v19 = vadd.f32 %v558_v16, %v3593_v6 }
 0xdb5   :  { %947 = vst [vmem:[#allocation2 + $0x160] sm:$0xff] %v557_v7 }
 0xdb6   :  { %948 = vst [vmem:[#allocation2 + $0x168] sm:$0xff] %v559_v19  ;;  %v562_v23 = vpop.f32.mrb[46].mxu0 }
 0xdb7   :  { %v563_v26 = vadd.f32 %v562_v23, %v3591_v5  ;;  %v564_v27 = vpop.f32.mrb[47].mxu0 }
 0xdb8   :  { %v565_v30 = vadd.f32 %v564_v27, %v3593_v6 }
 0xdb9   :  { %949 = vst [vmem:[#allocation2 + $0x170] sm:$0xff] %v563_v26 }
 0xdba   :  { %v568_v63 = vpop.f32.mrb[48].mxu0  ;;  %950 = vst [vmem:[#allocation2 + $0x178] sm:$0xff] %v565_v30 }
 0xdbb   :  { %v569_v32 = vadd.f32 %v568_v63, %v3591_v5  ;;  %v570_v33 = vpop.f32.mrb[49].mxu0 }
 0xdbc   :  { %v571_v3 = vadd.f32 %v570_v33, %v3593_v6 }
 0xdbd   :  { %951 = vst [vmem:[#allocation2 + $0x180] sm:$0xff] %v569_v32 }
 0xdbe   :  { %v574_v38 = vpop.f32.mrb[50].mxu0  ;;  %952 = vst [vmem:[#allocation2 + $0x188] sm:$0xff] %v571_v3 }
 0xdbf   :  { %v575_v40 = vadd.f32 %v574_v38, %v3591_v5  ;;  %v576_v42 = vpop.f32.mrb[51].mxu0 }
 0xdc0   :  { %v577_v45 = vadd.f32 %v576_v42, %v3593_v6 }
 0xdc1   :  { %953 = vst [vmem:[#allocation2 + $0x190] sm:$0xff] %v575_v40 }
 0xdc2   :  { %v580_v46 = vpop.f32.mrb[52].mxu0  ;;  %954 = vst [vmem:[#allocation2 + $0x198] sm:$0xff] %v577_v45 }
 0xdc3   :  { %v581_v48 = vadd.f32 %v580_v46, %v3591_v5  ;;  %v582_v49 = vpop.f32.mrb[53].mxu0 }
 0xdc4   :  { %v583_v51 = vadd.f32 %v582_v49, %v3593_v6 }
 0xdc5   :  { %955 = vst [vmem:[#allocation2 + $0x1a0] sm:$0xff] %v581_v48 }
 0xdc6   :  { %956 = vst [vmem:[#allocation2 + $0x1a8] sm:$0xff] %v583_v51  ;;  %v586_v12 = vpop.f32.mrb[54].mxu0 }
 0xdc7   :  { %v587_v53 = vadd.f32 %v586_v12, %v3591_v5  ;;  %v588_v54 = vpop.f32.mrb[55].mxu0 }
 0xdc8   :  { %v589_v55 = vadd.f32 %v588_v54, %v3593_v6 }
 0xdc9   :  { %957 = vst [vmem:[#allocation2 + $0x1b0] sm:$0xff] %v587_v53 }
 0xdca   :  { %v592_v56 = vpop.f32.mrb[56].mxu0  ;;  %958 = vst [vmem:[#allocation2 + $0x1b8] sm:$0xff] %v589_v55 }
 0xdcb   :  { %v593_v57 = vadd.f32 %v592_v56, %v3591_v5  ;;  %v594_v58 = vpop.f32.mrb[57].mxu0 }
 0xdcc   :  { %v595_v59 = vadd.f32 %v594_v58, %v3593_v6 }
 0xdcd   :  { %959 = vst [vmem:[#allocation2 + $0x1c0] sm:$0xff] %v593_v57 }
 0xdce   :  { %960 = vst [vmem:[#allocation2 + $0x1c8] sm:$0xff] %v595_v59 }
 0xdf4   :  { %v598_v60 = vpop.f32.mrb[58].mxu0 }
 0xdf5   :  { %v599_v61 = vadd.f32 %v598_v60, %v3591_v5  ;;  %v600_v62 = vpop.f32.mrb[59].mxu0 }
 0xdf6   :  { %v601_v0 = vadd.f32 %v600_v62, %v3593_v6 }
 0xdf7   :  { %961 = vst [vmem:[#allocation2 + $0x1d0] sm:$0xff] %v599_v61 }
 0xdf8   :  { %v604_v1 = vpop.f32.mrb[60].mxu0  ;;  %962 = vst [vmem:[#allocation2 + $0x1d8] sm:$0xff] %v601_v0 }
 0xdf9   :  { %v605_v2 = vadd.f32 %v604_v1, %v3591_v5  ;;  %v606_v4 = vpop.f32.mrb[61].mxu0 }
 0xdfa   :  { %v607_v7 = vadd.f32 %v606_v4, %v3593_v6 }
 0xdfb   :  { %963 = vst [vmem:[#allocation2 + $0x1e0] sm:$0xff] %v605_v2 }
 0xdfc   :  { %964 = vst [vmem:[#allocation2 + $0x1e8] sm:$0xff] %v607_v7 }
 0xe68   :  { %v1884_v8 = vpop.f32.mrb[64].mxu1 }
 0xe69   :  { %v1891_v9 = vrot.slane %v1884_v8, 1  ;;  %v1886_v10 = vpop.f32.mrb[65].mxu1  ;;  %v610_v8 = vpop.f32.mrb[62].mxu0 }
 0xe6a   :  { %v1892_v11 = vrot.slane %v1886_v10, 1  ;;  %v612_v10 = vpop.f32.mrb[63].mxu0 }
 0xe6b   :  { %v1895_v20 = vadd.f32 %v3244_v17, %v1891_v9  ;;  %v611_v9 = vadd.f32 %v610_v8, %v3591_v5  ;;  %v616_v17 = vpop.f32.mrb[64].mxu0 }
 0xe6c   :  { %v1896_v14 = vadd.f32 %v3245_v13, %v1892_v11  ;;  %v613_v11 = vadd.f32 %v612_v10, %v3593_v6  ;;  %v618_v13 = vpop.f32.mrb[65].mxu0 }
 0xe6d   :  { %3238 = vtanh.f32 %v1895_v20  ;;  %965 = vst [vmem:[#allocation2 + $0x1f0] sm:$0xff] %v611_v9  ;;  %v617_v20 = vadd.f32 %v616_v17, %v3591_v5  ;;  %v622_v16 = vpop.f32.mrb[66].mxu0 }
 0xe6e   :  { %3240 = vtanh.f32 %v1896_v14  ;;  %966 = vst [vmem:[#allocation2 + $0x1f8] sm:$0xff] %v613_v11  ;;  %v619_v14 = vadd.f32 %v618_v13, %v3593_v6  ;;  %v623_v19 = vadd.f32 %v622_v16, %v3591_v5  ;;  %v624_v23 = vpop.f32.mrb[67].mxu0 }
 0xe6f   :  { %967 = vst [vmem:[#allocation2 + $0x200] sm:$0xff] %v617_v20  ;;  %v625_v26 = vadd.f32 %v624_v23, %v3593_v6  ;;  %v628_v27 = vpop.f32.mrb[68].mxu0 }
 0xe70   :  { %968 = vst [vmem:[#allocation2 + $0x208] sm:$0xff] %v619_v14  ;;  %969 = vst [vmem:[#allocation2 + $0x210] sm:$0xff] %v623_v19  ;;  %v629_v30 = vadd.f32 %v628_v27, %v3591_v5  ;;  %v630_v63 = vpop.f32.mrb[69].mxu0 }
 0xe71   :  { %970 = vst [vmem:[#allocation2 + $0x218] sm:$0xff] %v625_v26  ;;  %v634_v32 = vpop.f32.mrb[70].mxu0 }
 0xe72   :  { %971 = vst [vmem:[#allocation2 + $0x220] sm:$0xff] %v629_v30  ;;  %v635_v33 = vadd.f32 %v634_v32, %v3591_v5 }
 0xe74   :  { %973 = vst [vmem:[#allocation2 + $0x230] sm:$0xff] %v635_v33 }
 0xe77   :  { %v3239_v31 = vpop.eup %3238 }
 0xe78   :  { %v3241_v34 = vpop.eup %3240  ;;  %v1899_v35 = vmul.f32 0.5, %v3239_v31  ;;  %v631_v31 = vadd.f32 %v630_v63, %v3593_v6 }
 0xe79   :  { %v1900_v39 = vmul.f32 %v3241_v34, %v3656_v18  ;;  %v636_v34 = vpop.f32.mrb[71].mxu0 }
 0xe7a   :  { %v1901_v44 = vadd.f32 0.5, %v1899_v35  ;;  %972 = vst [vmem:[#allocation2 + $0x228] sm:$0xff] %v631_v31  ;;  %v637_v35 = vadd.f32 %v636_v34, %v3593_v6  ;;  %v640_v3 = vpop.f32.mrb[72].mxu0 }
 0xe7b   :  { %v4099_v47 = vadd.f32 %v1900_v39, %v3658_v25  ;;  %v641_v38 = vadd.f32 %v640_v3, %v3591_v5  ;;  %v642_v39 = vpop.f32.mrb[73].mxu0 }
 0xe7c   :  { %v4102_v50 = vmul.f32 %v1904_v43, %v1901_v44  ;;  %974 = vst [vmem:[#allocation2 + $0x238] sm:$0xff] %v637_v35  ;;  %v643_v40 = vadd.f32 %v642_v39, %v3593_v6  ;;  %v646_v42 = vpop.f32.mrb[74].mxu0 }
 0xe7d   :  { %v1907_v52 = vmul.f32 %v4099_v47, %v1901_v44  ;;  %975 = vst [vmem:[#allocation2 + $0x240] sm:$0xff] %v641_v38  ;;  %v647_v43 = vadd.f32 %v646_v42, %v3591_v5  ;;  %v648_v44 = vpop.f32.mrb[75].mxu0 }
 0xe7e   :  { %976 = vst [vmem:[#allocation2 + $0x248] sm:$0xff] %v643_v40  ;;  %v649_v45 = vadd.f32 %v648_v44, %v3593_v6  ;;  %v652_v46 = vpop.f32.mrb[76].mxu0 }
 0xe7f   :  { %1909 = vrot.lane.b32.xlu1 %v1907_v52, %s3320_s2  ;;  %977 = vst [vmem:[#allocation2 + $0x250] sm:$0xff] %v647_v43  ;;  %v653_v48 = vadd.f32 %v652_v46, %v3591_v5  ;;  %v654_v49 = vpop.f32.mrb[77].mxu0 }
 0xe80   :  { %978 = vst [vmem:[#allocation2 + $0x258] sm:$0xff] %v649_v45  ;;  %v655_v51 = vadd.f32 %v654_v49, %v3593_v6  ;;  %v658_v52 = vpop.f32.mrb[78].mxu0 }
 0xe81   :  { %979 = vst [vmem:[#allocation2 + $0x260] sm:$0xff] %v653_v48  ;;  %v659_v12 = vadd.f32 %v658_v52, %v3591_v5  ;;  %v660_v53 = vpop.f32.mrb[79].mxu0 }
 0xe82   :  { %980 = vst [vmem:[#allocation2 + $0x268] sm:$0xff] %v655_v51  ;;  %v661_v54 = vadd.f32 %v660_v53, %v3593_v6  ;;  %v664_v55 = vpop.f32.mrb[80].mxu0 }
 0xe83   :  { %981 = vst [vmem:[#allocation2 + $0x270] sm:$0xff] %v659_v12  ;;  %v665_v56 = vadd.f32 %v664_v55, %v3591_v5  ;;  %v666_v57 = vpop.f32.mrb[81].mxu0 }
 0xe84   :  { %982 = vst [vmem:[#allocation2 + $0x278] sm:$0xff] %v661_v54  ;;  %v667_v58 = vadd.f32 %v666_v57, %v3593_v6  ;;  %v670_v59 = vpop.f32.mrb[82].mxu0 }
 0xe85   :  { %983 = vst [vmem:[#allocation2 + $0x280] sm:$0xff] %v665_v56  ;;  %v671_v60 = vadd.f32 %v670_v59, %v3591_v5  ;;  %v672_v61 = vpop.f32.mrb[83].mxu0 }
 0xe86   :  { %984 = vst [vmem:[#allocation2 + $0x288] sm:$0xff] %v667_v58  ;;  %v673_v62 = vadd.f32 %v672_v61, %v3593_v6  ;;  %v676_v0 = vpop.f32.mrb[84].mxu0 }
 0xe87   :  { %985 = vst [vmem:[#allocation2 + $0x290] sm:$0xff] %v671_v60  ;;  %v677_v1 = vadd.f32 %v676_v0, %v3591_v5  ;;  %v678_v2 = vpop.f32.mrb[85].mxu0 }
 0xe88   :  { %986 = vst [vmem:[#allocation2 + $0x298] sm:$0xff] %v673_v62  ;;  %v679_v4 = vadd.f32 %v678_v2, %v3593_v6  ;;  %v682_v7 = vpop.f32.mrb[86].mxu0 }
 0xe89   :  { %987 = vst [vmem:[#allocation2 + $0x2a0] sm:$0xff] %v677_v1  ;;  %v683_v8 = vadd.f32 %v682_v7, %v3591_v5  ;;  %v684_v9 = vpop.f32.mrb[87].mxu0 }
 0xe8a   :  { %988 = vst [vmem:[#allocation2 + $0x2a8] sm:$0xff] %v679_v4  ;;  %v685_v10 = vadd.f32 %v684_v9, %v3593_v6  ;;  %v688_v11 = vpop.f32.mrb[88].mxu0 }
 0xe8b   :  { %989 = vst [vmem:[#allocation2 + $0x2b0] sm:$0xff] %v683_v8  ;;  %v689_v17 = vadd.f32 %v688_v11, %v3591_v5  ;;  %v690_v20 = vpop.f32.mrb[89].mxu0 }
 0xe8c   :  { %990 = vst [vmem:[#allocation2 + $0x2b8] sm:$0xff] %v685_v10  ;;  %v691_v13 = vadd.f32 %v690_v20, %v3593_v6  ;;  %v694_v14 = vpop.f32.mrb[90].mxu0 }
 0xe8d   :  { %991 = vst [vmem:[#allocation2 + $0x2c0] sm:$0xff] %v689_v17  ;;  %v695_v16 = vadd.f32 %v694_v14, %v3591_v5  ;;  %v696_v19 = vpop.f32.mrb[91].mxu0 }
 0xe8e   :  { %992 = vst [vmem:[#allocation2 + $0x2c8] sm:$0xff] %v691_v13  ;;  %v697_v23 = vadd.f32 %v696_v19, %v3593_v6  ;;  %v700_v26 = vpop.f32.mrb[92].mxu0 }
 0xe8f   :  { %993 = vst [vmem:[#allocation2 + $0x2d0] sm:$0xff] %v695_v16  ;;  %v701_v27 = vadd.f32 %v700_v26, %v3591_v5  ;;  %v702_v30 = vpop.f32.mrb[93].mxu0 }
 0xe90   :  { %994 = vst [vmem:[#allocation2 + $0x2d8] sm:$0xff] %v697_v23  ;;  %v703_v63 = vadd.f32 %v702_v30, %v3593_v6  ;;  %v706_v31 = vpop.f32.mrb[94].mxu0 }
 0xe91   :  { %995 = vst [vmem:[#allocation2 + $0x2e0] sm:$0xff] %v701_v27  ;;  %v707_v32 = vadd.f32 %v706_v31, %v3591_v5  ;;  %v708_v33 = vpop.f32.mrb[95].mxu0 }
 0xe92   :  { %996 = vst [vmem:[#allocation2 + $0x2e8] sm:$0xff] %v703_v63  ;;  %v709_v34 = vadd.f32 %v708_v33, %v3593_v6  ;;  %v712_v35 = vpop.f32.mrb[96].mxu0 }
 0xe93   :  { %997 = vst [vmem:[#allocation2 + $0x2f0] sm:$0xff] %v707_v32  ;;  %v713_v3 = vadd.f32 %v712_v35, %v3591_v5  ;;  %v714_v38 = vpop.f32.mrb[97].mxu0 }
 0xe94   :  { %998 = vst [vmem:[#allocation2 + $0x2f8] sm:$0xff] %v709_v34  ;;  %v715_v39 = vadd.f32 %v714_v38, %v3593_v6  ;;  %v718_v40 = vpop.f32.mrb[98].mxu0 }
 0xe95   :  { %999 = vst [vmem:[#allocation2 + $0x300] sm:$0xff] %v713_v3  ;;  %v719_v42 = vadd.f32 %v718_v40, %v3591_v5  ;;  %v720_v43 = vpop.f32.mrb[99].mxu0 }
 0xe96   :  { %1000 = vst [vmem:[#allocation2 + $0x308] sm:$0xff] %v715_v39  ;;  %v721_v44 = vadd.f32 %v720_v43, %v3593_v6  ;;  %v724_v45 = vpop.f32.mrb[100].mxu0 }
 0xe97   :  { %1001 = vst [vmem:[#allocation2 + $0x310] sm:$0xff] %v719_v42  ;;  %v725_v46 = vadd.f32 %v724_v45, %v3591_v5  ;;  %v726_v48 = vpop.f32.mrb[101].mxu0 }
 0xe98   :  { %1002 = vst [vmem:[#allocation2 + $0x318] sm:$0xff] %v721_v44  ;;  %v727_v49 = vadd.f32 %v726_v48, %v3593_v6  ;;  %v730_v51 = vpop.f32.mrb[102].mxu0 }
 0xe99   :  { %1003 = vst [vmem:[#allocation2 + $0x320] sm:$0xff] %v725_v46  ;;  %v731_v52 = vadd.f32 %v730_v51, %v3591_v5  ;;  %v732_v12 = vpop.f32.mrb[103].mxu0 }
 0xe9a   :  { %1004 = vst [vmem:[#allocation2 + $0x328] sm:$0xff] %v727_v49  ;;  %v733_v53 = vadd.f32 %v732_v12, %v3593_v6  ;;  %v736_v54 = vpop.f32.mrb[104].mxu0 }
 0xe9b   :  { %1005 = vst [vmem:[#allocation2 + $0x330] sm:$0xff] %v731_v52  ;;  %v737_v55 = vadd.f32 %v736_v54, %v3591_v5  ;;  %v738_v56 = vpop.f32.mrb[105].mxu0 }
 0xe9c   :  { %1006 = vst [vmem:[#allocation2 + $0x338] sm:$0xff] %v733_v53  ;;  %v739_v57 = vadd.f32 %v738_v56, %v3593_v6  ;;  %v742_v58 = vpop.f32.mrb[106].mxu0 }
 0xe9d   :  { %1007 = vst [vmem:[#allocation2 + $0x340] sm:$0xff] %v737_v55  ;;  %v743_v59 = vadd.f32 %v742_v58, %v3591_v5  ;;  %v744_v60 = vpop.f32.mrb[107].mxu0 }
 0xe9e   :  { %1008 = vst [vmem:[#allocation2 + $0x348] sm:$0xff] %v739_v57  ;;  %v745_v61 = vadd.f32 %v744_v60, %v3593_v6  ;;  %v748_v62 = vpop.f32.mrb[108].mxu0 }
 0xe9f   :  { %1009 = vst [vmem:[#allocation2 + $0x350] sm:$0xff] %v743_v59  ;;  %v749_v1 = vadd.f32 %v748_v62, %v3591_v5  ;;  %v750_v2 = vpop.f32.mrb[109].mxu0 }
 0xea0   :  { %1010 = vst [vmem:[#allocation2 + $0x358] sm:$0xff] %v745_v61  ;;  %v751_v7 = vadd.f32 %v750_v2, %v3593_v6 }
 0xea1   :  { %1011 = vst [vmem:[#allocation2 + $0x360] sm:$0xff] %v749_v1 }
 0xea2   :  { %1012 = vst [vmem:[#allocation2 + $0x368] sm:$0xff] %v751_v7 }
 0xef1   :  { %v1910_v0 = vpop.permute.xlu1 %1909 }
 0xef2   :  { %v1912_v4 = vadd.f32 %v1910_v0, %v4102_v50  }
 0xef4   :  { %3242 = vtanh.f32 %v1912_v4 }
 0xefe   :  { %v3243_v8 = vpop.eup %3242 }
 0xeff   :  { %v1914_v9 = vmul.f32 %v3243_v8, %v4099_v47  }
 0xf01   :  { %v1928_v10 = vsel %vm1927_vm10, %v3791_v24, %v1914_v9 }
 0xf02   :  { %1930 = vrot.lane.b32.xlu0 %v1928_v10, %s3320_s2 }
 0xf74   :  { %v1931_v11 = vpop.permute.xlu0 %1930 }
 0xf75   :  { %1933 = vst.msk [vmem:[%s4347_s4] sm:$0xff] %vm1097_vm3, %v1931_v11 }
 0xf76 LB: > { %3036 = vmatprep.subr.bf16.mxu0 %v3380_v15  ;;  %3052 = vmatprep.subr.bf16.mxu1 %v3380_v15  ;;  %v3321_v5 = vmov 0.0   ;;  %v1951_v6 = vrot.slane %v3312_v9, 7  ;;  %s3322_s2 = smov 64   ;;  %s2887_s6 = sshll.u32 %s3316_s5, 3  ;;  %v2036_v31 = vrot.slane %v3308_v4, 7  ;;  %s3316_s5 = sphi %s4176_s5, %s1939_s5   ;;  %v3312_v9 = vphi %v1914_v9, %v2766_v9   ;;  %v3308_v4 = vphi %v1912_v4, %v2764_v4  }
 0xf77   : > { %3038 = vmatpush1.bf16.msra.mxu0 %v3397_v21  ;;  %2020 = vmatprep.mubr.f32.mxu0 %v3321_v5  ;;  %s1943_s7 = sshra.s32 %s2887_s6, 3  ;;  %s2778_s11 = scalar_lea.vmem %s4347_s4, %s2887_s6 }
 0xf78   : > { %3040 = vmatprep.subr.bf16.mxu0 %v3400_v22  ;;  %3054 = vmatpush1.bf16.msra.mxu1 %v3397_v21  ;;  %s2898_s8 = sshll.u32 %s1943_s7, 4  ;;  %s1939_s5 = sadd.s32 1, %s3316_s5  }
 0xf79   : > { %3056 = vmatprep.subr.bf16.mxu1 %v3400_v22  ;;  %2116 = vmatprep.mubr.f32.mxu1 %v3321_v5  ;;  %s1947_s9 = scalar_lea.vmem [#allocation2], %s2898_s8  ;;  %p1936_p0 = scmp.ge.s32.totalorder %s1939_s5, 80  }
 0xf7a   : > { %1952 = vrot.lane.b32.xlu0 %v1951_v6, %s3322_s2  ;;  %v4217_v47 = vld [vmem:[%s1947_s9] sm:$0xff]  ;;  %v4219_v50 = vld [vmem:[%s1947_s9 + $0x8] sm:$0xff] }
 0xf7b   : > { %3042 = vmatpush1.bf16.msra.mxu0 %v3420_v28 }
 0xf7c   : > { %3044 = vmatprep.subr.bf16.mxu0 %v3423_v29  ;;  %3058 = vmatpush1.bf16.msra.mxu1 %v3420_v28 }
 0xf7d   : > { %3060 = vmatprep.subr.bf16.mxu1 %v3423_v29 }
 0xf7f   : > { %3046 = vmatpush1.bf16.msra.mxu0 %v3446_v36 }
 0xf80   : > { %3048 = vmatprep.subr.bf16.mxu0 %v3449_v37  ;;  %3062 = vmatpush1.bf16.msra.mxu1 %v3446_v36 }
 0xf81   : > { %3064 = vmatprep.subr.bf16.mxu1 %v3449_v37 }
 0xf83   : > { %3050 = vmatpush1.bf16.msra.mxu0 %v3465_v41 }
 0xf84   : > { %3066 = vmatpush1.bf16.msra.mxu1 %v3465_v41  ;;  %3068 = vmatprep.subr.bf16.mxu0 %v3380_v15 }
 0xf85   : > { %3084 = vmatprep.subr.bf16.mxu1 %v3380_v15 }
 0xfec   : > { %v1953_v24 = vpop.permute.xlu0 %1952 }
 0xfed   : > { %2890 = vmatmul.mubr.msk.f32.vlgmr.msra.gmra.mrb[0].mxu0 %vm1097_vm3, %v1953_v24 }
 0xfee   : > { %3070 = vmatpush1.bf16.msra.mxu0 %v3397_v21  ;;  %2219 = vmatprep.mubr.f32.mxu0 %v3321_v5 }
 0xfef   : > { %3072 = vmatprep.subr.bf16.mxu0 %v3400_v22 }
 0xff2   : > { %3074 = vmatpush1.bf16.msra.mxu0 %v3420_v28 }
 0xff3   : > { %3076 = vmatprep.subr.bf16.mxu0 %v3423_v29 }
 0xff6   : > { %3078 = vmatpush1.bf16.msra.mxu0 %v3446_v36 }
 0xff7   : > { %3080 = vmatprep.subr.bf16.mxu0 %v3449_v37 }
 0xffa   : > { %3082 = vmatpush1.bf16.msra.mxu0 %v3465_v41 }
 0xffb   : > { %3100 = vmatprep.subr.bf16.mxu0 %v3380_v15 }
0x10c0   : > { %v2022_v17 = vpop.f32.mrb[0].mxu0 }
0x10c1   : > { %v2027_v20 = vadd.f32 %v2022_v17, %v4217_v47  ;;  %v2024_v13 = vpop.f32.mrb[1].mxu0 }
0x10c2   : > { %v2028_v14 = vadd.f32 %v2024_v13, %v4219_v50 }
0x10c3   : > { %3246 = vtanh.f32 %v2027_v20 }
0x10c4   : > { %3248 = vtanh.f32 %v2028_v14 }
0x10cd   : > { %v3247_v16 = vpop.eup %3246 }
0x10ce   : > { %v3249_v19 = vpop.eup %3248  ;;  %v2031_v23 = vmul.f32 0.5, %v3247_v16 }
0x10cf   : > { %v2032_v26 = vmul.f32 %v3249_v19, %v3656_v18 }
0x10d0   : > { %v2033_v27 = vadd.f32 0.5, %v2031_v23 }
0x10d1   : > { %v2034_v30 = vadd.f32 %v2032_v26, %v3658_v25 }
0x10d2   : > { %v2038_v32 = vmul.f32 %v2036_v31, %v2033_v27 }
0x10d3   : > { %v2039_v63 = vmul.f32 %v2034_v30, %v2033_v27 }
0x10d5   : > { %2041 = vrot.lane.b32.xlu0 %v2039_v63, %s3322_s2 }
0x1147   : > { %v2042_v33 = vpop.permute.xlu0 %2041 }
0x1148   : > { %v2044_v34 = vadd.f32 %v2042_v33, %v2038_v32 }
0x114a   : > { %3250 = vtanh.f32 %v2044_v34  ;;  %v2138_v52 = vrot.slane %v2044_v34, 7 }
0x1154   : > { %v3251_v35 = vpop.eup %3250 }
0x1155   : > { %v4226_v3 = vmul.f32 %v3251_v35, %v2034_v30 }
0x1157   : > { %2048 = vrot.lane.b32.xlu1 %v4226_v3, %s3322_s2 }
0x11c9   : > { %v2049_v38 = vpop.permute.xlu1 %2048 }
0x11ca   : > { %2891 = vmatmul.mubr.msk.f32.vlgmr.msra.gmra.mrb[0].mxu1 %vm1097_vm3, %v2049_v38 }
0x11cb   : > { %3086 = vmatpush1.bf16.msra.mxu1 %v3397_v21  ;;  %2322 = vmatprep.mubr.f32.mxu1 %v3321_v5 }
0x11cc   : > { %3088 = vmatprep.subr.bf16.mxu1 %v3400_v22 }
0x11cf   : > { %3090 = vmatpush1.bf16.msra.mxu1 %v3420_v28 }
0x11d0   : > { %3092 = vmatprep.subr.bf16.mxu1 %v3423_v29 }
0x11d3   : > { %3094 = vmatpush1.bf16.msra.mxu1 %v3446_v36 }
0x11d4   : > { %3096 = vmatprep.subr.bf16.mxu1 %v3449_v37 }
0x11d7   : > { %3098 = vmatpush1.bf16.msra.mxu1 %v3465_v41 }
0x11d8   : > { %3116 = vmatprep.subr.bf16.mxu1 %v3380_v15 }
0x129d   : > { %v2118_v39 = vpop.f32.mrb[0].mxu1 }
0x129e   : > { %v2125_v40 = vrot.slane %v2118_v39, 7  ;;  %v2120_v42 = vpop.f32.mrb[1].mxu1 }
0x129f   : > { %v2126_v43 = vrot.slane %v2120_v42, 7 }
0x12a0   : > { %v2129_v44 = vadd.f32 %v2125_v40, %v4217_v47 }
0x12a1   : > { %v2130_v45 = vadd.f32 %v2126_v43, %v4219_v50 }
0x12a2   : > { %3252 = vtanh.f32 %v2129_v44 }
0x12a3   : > { %3254 = vtanh.f32 %v2130_v45 }
0x12ac   : > { %v3253_v46 = vpop.eup %3252 }
0x12ad   : > { %v3255_v48 = vpop.eup %3254  ;;  %v2133_v49 = vmul.f32 0.5, %v3253_v46 }
0x12ae   : > { %v2134_v51 = vmul.f32 %v3255_v48, %v3656_v18 }
0x12af   : > { %v2135_v12 = vadd.f32 0.5, %v2133_v49 }
0x12b0   : > { %v2136_v53 = vadd.f32 %v2134_v51, %v3658_v25 }
0x12b1   : > { %v2140_v54 = vmul.f32 %v2138_v52, %v2135_v12 }
0x12b2   : > { %v2141_v55 = vmul.f32 %v2136_v53, %v2135_v12 }
0x12b4   : > { %2143 = vrot.lane.b32.xlu1 %v2141_v55, %s3322_s2 }
0x1326   : > { %v2144_v56 = vpop.permute.xlu1 %2143 }
0x1327   : > { %v2146_v57 = vadd.f32 %v2144_v56, %v2140_v54 }
0x1329   : > { %3256 = vtanh.f32 %v2146_v57  ;;  %v2241_v6 = vrot.slane %v2146_v57, 7 }
0x1333   : > { %v3257_v58 = vpop.eup %3256 }
0x1334   : > { %v2148_v59 = vmul.f32 %v3257_v58, %v2136_v53 }
0x1336   : > { %v2150_v60 = vrot.slane %v2148_v59, 1  ;;  %v2767_v26 = vsel %vm1915_vm4, %v4226_v3, %v2148_v59 }
0x1338   : > { %2151 = vrot.lane.b32.xlu0 %v2150_v60, %s3322_s2 }
0x13aa   : > { %v2152_v61 = vpop.permute.xlu0 %2151 }
0x13ab   : > { %2892 = vmatmul.mubr.msk.f32.vlgmr.msra.gmra.mrb[2].mxu0 %vm1097_vm3, %v2152_v61 }
0x13ac   : > { %3102 = vmatpush1.bf16.msra.mxu0 %v3397_v21  ;;  %2425 = vmatprep.mubr.f32.mxu0 %v3321_v5 }
0x13ad   : > { %3104 = vmatprep.subr.bf16.mxu0 %v3400_v22 }
0x13b0   : > { %3106 = vmatpush1.bf16.msra.mxu0 %v3420_v28 }
0x13b1   : > { %3108 = vmatprep.subr.bf16.mxu0 %v3423_v29 }
0x13b4   : > { %3110 = vmatpush1.bf16.msra.mxu0 %v3446_v36 }
0x13b5   : > { %3112 = vmatprep.subr.bf16.mxu0 %v3449_v37 }
0x13b8   : > { %3114 = vmatpush1.bf16.msra.mxu0 %v3465_v41 }
0x13b9   : > { %3132 = vmatprep.subr.bf16.mxu0 %v3380_v15 }
0x147e   : > { %v2221_v62 = vpop.f32.mrb[2].mxu0 }
0x147f   : > { %v2228_v0 = vrot.slane %v2221_v62, 6  ;;  %v2223_v1 = vpop.f32.mrb[3].mxu0 }
0x1480   : > { %v2229_v2 = vrot.slane %v2223_v1, 6 }
0x1481   : > { %v2232_v4 = vadd.f32 %v2228_v0, %v4217_v47 }
0x1482   : > { %v2233_v7 = vadd.f32 %v2229_v2, %v4219_v50 }
0x1483   : > { %3258 = vtanh.f32 %v2232_v4 }
0x1484   : > { %3260 = vtanh.f32 %v2233_v7 }
0x148d   : > { %v3259_v8 = vpop.eup %3258 }
0x148e   : > { %v3261_v9 = vpop.eup %3260  ;;  %v2236_v10 = vmul.f32 0.5, %v3259_v8 }
0x148f   : > { %v2237_v11 = vmul.f32 %v3261_v9, %v3656_v18 }
0x1490   : > { %v2238_v24 = vadd.f32 0.5, %v2236_v10 }
0x1491   : > { %v2239_v17 = vadd.f32 %v2237_v11, %v3658_v25 }
0x1492   : > { %v2243_v20 = vmul.f32 %v2241_v6, %v2238_v24 }
0x1493   : > { %v2244_v13 = vmul.f32 %v2239_v17, %v2238_v24 }
0x1495   : > { %2246 = vrot.lane.b32.xlu1 %v2244_v13, %s3322_s2 }
0x1507   : > { %v2247_v14 = vpop.permute.xlu1 %2246 }
0x1508   : > { %v2249_v16 = vadd.f32 %v2247_v14, %v2243_v20 }
0x150a   : > { %3262 = vtanh.f32 %v2249_v16  ;;  %v2344_v43 = vrot.slane %v2249_v16, 7 }
0x1514   : > { %v3263_v19 = vpop.eup %3262 }
0x1515   : > { %v2251_v23 = vmul.f32 %v3263_v19, %v2239_v17 }
0x1517   : > { %v2253_v27 = vrot.slane %v2251_v23, 2  ;;  %v2768_v30 = vsel %vm1917_vm5, %v2767_v26, %v2251_v23 }
0x1519   : > { %2254 = vrot.lane.b32.xlu0 %v2253_v27, %s3322_s2 }
0x158b   : > { %v2255_v63 = vpop.permute.xlu0 %2254 }
0x158c   : > { %2893 = vmatmul.mubr.msk.f32.vlgmr.msra.gmra.mrb[2].mxu1 %vm1097_vm3, %v2255_v63 }
0x158d   : > { %3118 = vmatpush1.bf16.msra.mxu1 %v3397_v21  ;;  %2528 = vmatprep.mubr.f32.mxu1 %v3321_v5 }
0x158e   : > { %3120 = vmatprep.subr.bf16.mxu1 %v3400_v22 }
0x1591   : > { %3122 = vmatpush1.bf16.msra.mxu1 %v3420_v28 }
0x1592   : > { %3124 = vmatprep.subr.bf16.mxu1 %v3423_v29 }
0x1595   : > { %3126 = vmatpush1.bf16.msra.mxu1 %v3446_v36 }
0x1596   : > { %3128 = vmatprep.subr.bf16.mxu1 %v3449_v37 }
0x1599   : > { %3130 = vmatpush1.bf16.msra.mxu1 %v3465_v41 }
0x159a   : > { %3148 = vmatprep.subr.bf16.mxu1 %v3380_v15 }
0x165f   : > { %v2324_v31 = vpop.f32.mrb[2].mxu1 }
0x1660   : > { %v2331_v32 = vrot.slane %v2324_v31, 5  ;;  %v2326_v33 = vpop.f32.mrb[3].mxu1 }
0x1661   : > { %v2332_v34 = vrot.slane %v2326_v33, 5 }
0x1662   : > { %v2335_v35 = vadd.f32 %v2331_v32, %v4217_v47 }
0x1663   : > { %v2336_v3 = vadd.f32 %v2332_v34, %v4219_v50 }
0x1664   : > { %3264 = vtanh.f32 %v2335_v35 }
0x1665   : > { %3266 = vtanh.f32 %v2336_v3 }
0x166e   : > { %v3265_v38 = vpop.eup %3264 }
0x166f   : > { %v3267_v39 = vpop.eup %3266  ;;  %v2339_v40 = vmul.f32 0.5, %v3265_v38 }
0x1670   : > { %v2340_v42 = vmul.f32 %v3267_v39, %v3656_v18 }
0x1671   : > { %v2341_v44 = vadd.f32 0.5, %v2339_v40 }
0x1672   : > { %v2342_v45 = vadd.f32 %v2340_v42, %v3658_v25 }
0x1673   : > { %v2346_v46 = vmul.f32 %v2344_v43, %v2341_v44 }
0x1674   : > { %v2347_v48 = vmul.f32 %v2342_v45, %v2341_v44 }
0x1676   : > { %2349 = vrot.lane.b32.xlu1 %v2347_v48, %s3322_s2 }
0x16e8   : > { %v2350_v49 = vpop.permute.xlu1 %2349 }
0x16e9   : > { %v2352_v51 = vadd.f32 %v2350_v49, %v2346_v46 }
0x16eb   : > { %3268 = vtanh.f32 %v2352_v51  ;;  %v2447_v4 = vrot.slane %v2352_v51, 7 }
0x16f5   : > { %v3269_v52 = vpop.eup %3268 }
0x16f6   : > { %v2354_v12 = vmul.f32 %v3269_v52, %v2342_v45 }
0x16f8   : > { %v2356_v53 = vrot.slane %v2354_v12, 3  ;;  %v2769_v54 = vsel %vm1919_vm6, %v2768_v30, %v2354_v12 }
0x16fa   : > { %2357 = vrot.lane.b32.xlu0 %v2356_v53, %s3322_s2 }
0x176c   : > { %v2358_v55 = vpop.permute.xlu0 %2357 }
0x176d   : > { %2894 = vmatmul.mubr.msk.f32.vlgmr.msra.gmra.mrb[4].mxu0 %vm1097_vm3, %v2358_v55 }
0x176e   : > { %3134 = vmatpush1.bf16.msra.mxu0 %v3397_v21  ;;  %2631 = vmatprep.mubr.f32.mxu0 %v3321_v5 }
0x176f   : > { %3136 = vmatprep.subr.bf16.mxu0 %v3400_v22 }
0x1772   : > { %3138 = vmatpush1.bf16.msra.mxu0 %v3420_v28 }
0x1773   : > { %3140 = vmatprep.subr.bf16.mxu0 %v3423_v29 }
0x1776   : > { %3142 = vmatpush1.bf16.msra.mxu0 %v3446_v36 }
0x1777   : > { %3144 = vmatprep.subr.bf16.mxu0 %v3449_v37 }
0x177a   : > { %3146 = vmatpush1.bf16.msra.mxu0 %v3465_v41 }
0x1840   : > { %v2427_v56 = vpop.f32.mrb[4].mxu0 }
0x1841   : > { %v2434_v57 = vrot.slane %v2427_v56, 4  ;;  %v2429_v58 = vpop.f32.mrb[5].mxu0 }
0x1842   : > { %v2435_v59 = vrot.slane %v2429_v58, 4 }
0x1843   : > { %v2438_v60 = vadd.f32 %v2434_v57, %v4217_v47 }
0x1844   : > { %v2439_v61 = vadd.f32 %v2435_v59, %v4219_v50 }
0x1845   : > { %3270 = vtanh.f32 %v2438_v60 }
0x1846   : > { %3272 = vtanh.f32 %v2439_v61 }
0x184f   : > { %v3271_v62 = vpop.eup %3270 }
0x1850   : > { %v3273_v0 = vpop.eup %3272  ;;  %v2442_v1 = vmul.f32 0.5, %v3271_v62 }
0x1851   : > { %v2443_v2 = vmul.f32 %v3273_v0, %v3656_v18 }
0x1852   : > { %v2444_v7 = vadd.f32 0.5, %v2442_v1 }
0x1853   : > { %v2445_v8 = vadd.f32 %v2443_v2, %v3658_v25 }
0x1854   : > { %v2449_v9 = vmul.f32 %v2447_v4, %v2444_v7 }
0x1855   : > { %v2450_v10 = vmul.f32 %v2445_v8, %v2444_v7 }
0x1857   : > { %2452 = vrot.lane.b32.xlu1 %v2450_v10, %s3322_s2 }
0x18c9   : > { %v2453_v11 = vpop.permute.xlu1 %2452 }
0x18ca   : > { %v2455_v6 = vadd.f32 %v2453_v11, %v2449_v9 }
0x18cc   : > { %3274 = vtanh.f32 %v2455_v6  ;;  %v2550_v33 = vrot.slane %v2455_v6, 7 }
0x18d6   : > { %v3275_v24 = vpop.eup %3274 }
0x18d7   : > { %v2457_v17 = vmul.f32 %v3275_v24, %v2445_v8 }
0x18d9   : > { %v2459_v20 = vrot.slane %v2457_v17, 4  ;;  %v2770_v13 = vsel %vm1921_vm7, %v2769_v54, %v2457_v17 }
0x18db   : > { %2460 = vrot.lane.b32.xlu0 %v2459_v20, %s3322_s2 }
0x194d   : > { %v2461_v14 = vpop.permute.xlu0 %2460 }
0x194e   : > { %2895 = vmatmul.mubr.msk.f32.vlgmr.msra.gmra.mrb[4].mxu1 %vm1097_vm3, %v2461_v14 }
0x194f   : > { %3150 = vmatpush1.bf16.msra.mxu1 %v3397_v21  ;;  %2734 = vmatprep.mubr.f32.mxu1 %v3321_v5 }
0x1950   : > { %3152 = vmatprep.subr.bf16.mxu1 %v3400_v22 }
0x1953   : > { %3154 = vmatpush1.bf16.msra.mxu1 %v3420_v28 }
0x1954   : > { %3156 = vmatprep.subr.bf16.mxu1 %v3423_v29 }
0x1957   : > { %3158 = vmatpush1.bf16.msra.mxu1 %v3446_v36 }
0x1958   : > { %3160 = vmatprep.subr.bf16.mxu1 %v3449_v37 }
0x195b   : > { %3162 = vmatpush1.bf16.msra.mxu1 %v3465_v41 }
0x1a21   : > { %v2530_v16 = vpop.f32.mrb[4].mxu1 }
0x1a22   : > { %v2537_v19 = vrot.slane %v2530_v16, 3  ;;  %v2532_v23 = vpop.f32.mrb[5].mxu1 }
0x1a23   : > { %v2538_v26 = vrot.slane %v2532_v23, 3 }
0x1a24   : > { %v2541_v27 = vadd.f32 %v2537_v19, %v4217_v47 }
0x1a25   : > { %v2542_v5 = vadd.f32 %v2538_v26, %v4219_v50 }
0x1a26   : > { %3276 = vtanh.f32 %v2541_v27 }
0x1a27   : > { %3278 = vtanh.f32 %v2542_v5 }
0x1a30   : > { %v3277_v30 = vpop.eup %3276 }
0x1a31   : > { %v3279_v63 = vpop.eup %3278  ;;  %v2545_v31 = vmul.f32 0.5, %v3277_v30 }
0x1a32   : > { %v2546_v32 = vmul.f32 %v3279_v63, %v3656_v18 }
0x1a33   : > { %v2547_v34 = vadd.f32 0.5, %v2545_v31 }
0x1a34   : > { %v2548_v35 = vadd.f32 %v2546_v32, %v3658_v25 }
0x1a35   : > { %v2552_v3 = vmul.f32 %v2550_v33, %v2547_v34 }
0x1a36   : > { %v2553_v38 = vmul.f32 %v2548_v35, %v2547_v34 }
0x1a38   : > { %2555 = vrot.lane.b32.xlu1 %v2553_v38, %s3322_s2 }
0x1aaa   : > { %v2556_v39 = vpop.permute.xlu1 %2555 }
0x1aab   : > { %v2558_v40 = vadd.f32 %v2556_v39, %v2552_v3 }
0x1aad   : > { %3280 = vtanh.f32 %v2558_v40  ;;  %v2653_v58 = vrot.slane %v2558_v40, 7 }
0x1ab7   : > { %v3281_v42 = vpop.eup %3280 }
0x1ab8   : > { %v2560_v43 = vmul.f32 %v3281_v42, %v2548_v35 }
0x1aba   : > { %v2562_v44 = vrot.slane %v2560_v43, 5  ;;  %v2771_v45 = vsel %vm1923_vm8, %v2770_v13, %v2560_v43 }
0x1abc   : > { %2563 = vrot.lane.b32.xlu0 %v2562_v44, %s3322_s2 }
0x1b2e   : > { %v2564_v46 = vpop.permute.xlu0 %2563 }
0x1b2f   : > { %2896 = vmatmul.mubr.msk.f32.vlgmr.msra.gmra.mrb[6].mxu0 %vm1097_vm3, %v2564_v46 }
0x1c02   : > { %v2633_v48 = vpop.f32.mrb[6].mxu0 }
0x1c03   : > { %v2640_v49 = vrot.slane %v2633_v48, 2  ;;  %v2635_v51 = vpop.f32.mrb[7].mxu0 }
0x1c04   : > { %v2641_v52 = vrot.slane %v2635_v51, 2 }
0x1c05   : > { %v2644_v12 = vadd.f32 %v2640_v49, %v4217_v47 }
0x1c06   : > { %v2645_v53 = vadd.f32 %v2641_v52, %v4219_v50 }
0x1c07   : > { %3282 = vtanh.f32 %v2644_v12 }
0x1c08   : > { %3284 = vtanh.f32 %v2645_v53 }
0x1c11   : > { %v3283_v54 = vpop.eup %3282 }
0x1c12   : > { %v3285_v55 = vpop.eup %3284  ;;  %v2648_v56 = vmul.f32 0.5, %v3283_v54 }
0x1c13   : > { %v2649_v57 = vmul.f32 %v3285_v55, %v3656_v18 }
0x1c14   : > { %v2650_v59 = vadd.f32 0.5, %v2648_v56 }
0x1c15   : > { %v2651_v60 = vadd.f32 %v2649_v57, %v3658_v25 }
0x1c16   : > { %v2655_v61 = vmul.f32 %v2653_v58, %v2650_v59 }
0x1c17   : > { %v2656_v62 = vmul.f32 %v2651_v60, %v2650_v59 }
0x1c19   : > { %2658 = vrot.lane.b32.xlu1 %v2656_v62, %s3322_s2 }
0x1c8b   : > { %v2659_v0 = vpop.permute.xlu1 %2658 }
0x1c8c   : > { %v2661_v1 = vadd.f32 %v2659_v0, %v2655_v61 }
0x1c8e   : > { %3286 = vtanh.f32 %v2661_v1  ;;  %v2756_v23 = vrot.slane %v2661_v1, 7 }
0x1c98   : > { %v3287_v2 = vpop.eup %3286 }
0x1c99   : > { %v2663_v4 = vmul.f32 %v3287_v2, %v2651_v60 }
0x1c9b   : > { %v2665_v7 = vrot.slane %v2663_v4, 6  ;;  %v2772_v8 = vsel %vm1925_vm9, %v2771_v45, %v2663_v4 }
0x1c9d   : > { %2666 = vrot.lane.b32.xlu0 %v2665_v7, %s3322_s2 }
0x1d0f   : > { %v2667_v9 = vpop.permute.xlu0 %2666 }
0x1d10   : > { %2897 = vmatmul.mubr.msk.f32.vlgmr.msra.gmra.mrb[6].mxu1 %vm1097_vm3, %v2667_v9 }
0x1de3   : > { %v2736_v10 = vpop.f32.mrb[6].mxu1 }
0x1de4   : > { %v2743_v11 = vrot.slane %v2736_v10, 1  ;;  %v2738_v6 = vpop.f32.mrb[7].mxu1 }
0x1de5   : > { %v2744_v24 = vrot.slane %v2738_v6, 1 }
0x1de6   : > { %v2747_v17 = vadd.f32 %v2743_v11, %v4217_v47 }
0x1de7   : > { %v2748_v20 = vadd.f32 %v2744_v24, %v4219_v50 }
0x1de8   : > { %3288 = vtanh.f32 %v2747_v17 }
0x1de9   : > { %3290 = vtanh.f32 %v2748_v20 }
0x1df2   : > { %v3289_v13 = vpop.eup %3288 }
0x1df3   : > { %v3291_v14 = vpop.eup %3290  ;;  %v2751_v16 = vmul.f32 0.5, %v3289_v13 }
0x1df4   : > { %v2752_v19 = vmul.f32 %v3291_v14, %v3656_v18 }
0x1df5   : > { %v2753_v26 = vadd.f32 0.5, %v2751_v16 }
0x1df6   : > { %v2754_v27 = vadd.f32 %v2752_v19, %v3658_v25 }
0x1df7   : > { %v2758_v5 = vmul.f32 %v2756_v23, %v2753_v26 }
0x1df8   : > { %v2759_v30 = vmul.f32 %v2754_v27, %v2753_v26 }
0x1dfa   : > { %2761 = vrot.lane.b32.xlu1 %v2759_v30, %s3322_s2 }
0x1e6c   : > { %v2762_v63 = vpop.permute.xlu1 %2761 }
0x1e6d   : > { %v2764_v4 = vadd.f32 %v2762_v63, %v2758_v5  }
0x1e6f   : > { %3292 = vtanh.f32 %v2764_v4 }
0x1e79   : > { %v3293_v47 = vpop.eup %3292 }
0x1e7a   : > { %v2766_v9 = vmul.f32 %v3293_v47, %v2754_v27  }
0x1e7c   : > { %v2773_v50 = vsel %vm1927_vm10, %v2772_v8, %v2766_v9 }
0x1e7d   : > { %2775 = vrot.lane.b32.xlu0 %v2773_v50, %s3322_s2 }
0x1eea   :  { %1938 = sbr.rel (!%p1936_p0) target bundleno = 3958 (0xf76), region = 45 }
0x1eef   : > { %v2776_v31 = vpop.permute.xlu0 %2775 }
0x1ef0   : > { %2779 = vst.msk [vmem:[%s2778_s11] sm:$0xff] %vm1097_vm3, %v2776_v31 }

</bundles_post_ra>
